<compile_context>
chip_gen: v6e
topology: v6e:2x2x1
jax: 0.10.0
libtpu: 0.0.40
codegen_flags: <defaults>
</compile_context>

<pallas_src>
import jax
import jax.numpy as jnp
from jax import lax
from jax.experimental import pallas as pl
from jax.experimental.pallas import tpu as pltpu

TEXT_HIDDEN = 768
VISION_HIDDEN = 512
VOCAB = 100
N_TOKEN_TYPES = 2
PATCH = 4
LANE = 128


# ----------------------------------------------------------------------------
# Fused Pallas kernel:
#   text embed (one-hot MXU gather) -> masked mean pool -> pooler dense+tanh
#   vision patch embed + ReLU + patch mean
#   fused concat + Linear head (lane-dense padded N)
# ----------------------------------------------------------------------------
def _fused_multimodal_kernel(texts_ref,     # (B*S, 1)    i32
                             tt_ref,        # (B*S, 1)    i32
                             mask_ref,      # (B, S)      f32
                             tok_emb_ref,   # (Vp, 768)   bf16 (vocab padded)
                             type_emb_ref,  # (2, 768)    f32
                             patch_ref,     # (B*P, D)    f32  im2col patches
                             w_pool_ref,    # (768, 768)  bf16
                             b_pool_ref,    # (1, 768)    f32
                             w_patch_ref,   # (D, 512)    bf16
                             b_patch_ref,   # (1, 512)    f32
                             w_head_ref,    # (1280, Np)  bf16 (zero padded N)
                             b_head_ref,    # (1, Np)     f32  (zero padded N)
                             o_ref):        # (B, Np)     f32
    f32 = jnp.float32
    bf16 = jnp.bfloat16

    B, S = mask_ref.shape
    BS = texts_ref.shape[0]
    Vp = tok_emb_ref.shape[0]

    # ---- text branch: in-kernel embedding lookup via one-hot MXU matmul ----
    ids = texts_ref[...]                                           # (BS, 1) i32
    onehot = (ids == lax.broadcasted_iota(jnp.int32, (BS, Vp), 1)).astype(bf16)
    tok = jnp.dot(onehot, tok_emb_ref[...],
                  preferred_element_type=f32)                      # (BS, 768)

    # Token-type embedding (N_TOKEN_TYPES == 2): 0/1 lerp of the two rows.
    ttf = tt_ref[...].astype(f32)                                  # (BS, 1)
    t0 = type_emb_ref[0:1, :]
    t1 = type_emb_ref[1:2, :]
    emb = tok + t0 + ttf * (t1 - t0)                               # (BS, 768)

    # Masked mean pool over the sequence (VPU multiply + sublane reduce).
    mask = mask_ref[...]                                           # (B, S)
    emb3 = emb.reshape(B, S, TEXT_HIDDEN)
    masked_sum = jnp.sum(emb3 * mask[:, :, None], axis=1)          # (B, 768)
    denom = jnp.maximum(jnp.sum(mask, axis=1, keepdims=True), 1.0)
    pooled = masked_sum * pl.reciprocal(denom, approx=True)        # EUP recip

    proj = jnp.dot(pooled.astype(bf16), w_pool_ref[...],
                   preferred_element_type=f32)                     # (B, 768)
    text_feat = jnp.tanh(proj + b_pool_ref[...])                   # f32

    # ---- vision branch: flat patch-embedding matmul + ReLU + patch mean ----
    h = jnp.dot(patch_ref[...].astype(bf16), w_patch_ref[...],
                preferred_element_type=f32)                        # (B*P, 512)
    h = jnp.maximum(h + b_patch_ref[...], 0.0)
    P = h.shape[0] // B
    vis_feat = jnp.sum(h.reshape(B, P, VISION_HIDDEN), axis=1) * (1.0 / P)

    # ---- fused concat + Linear head (lane-dense, N padded to 128) ----
    w_text = w_head_ref[:TEXT_HIDDEN, :]                           # (768, Np)
    w_vis = w_head_ref[TEXT_HIDDEN:, :]                            # (512, Np)
    out = jnp.dot(text_feat.astype(bf16), w_text, preferred_element_type=f32)
    out = out + jnp.dot(vis_feat.astype(bf16), w_vis,
                        preferred_element_type=f32)
    o_ref[...] = out + b_head_ref[...]


# ----------------------------------------------------------------------------
# One-time parameter preparation (hoisted out of the per-call forward).
# ----------------------------------------------------------------------------
def prepare_params(params):
    n_classes = int(params["w_head"].shape[1])
    n_pad = int(pl.cdiv(n_classes, LANE) * LANE)
    vocab = int(params["tok_emb"].shape[0])
    vocab_pad = int(pl.cdiv(vocab, LANE) * LANE)

    prepped = {
        "tok_emb": jnp.pad(params["tok_emb"].astype(jnp.float32),
                           ((0, vocab_pad - vocab), (0, 0))).astype(jnp.bfloat16),
        "type_emb": params["type_emb"].astype(jnp.float32),
        "w_pool": params["w_pool"].astype(jnp.bfloat16),
        "b_pool": params["b_pool"].astype(jnp.float32),
        "w_patch": params["w_patch"].astype(jnp.bfloat16),
        "b_patch": params["b_patch"].astype(jnp.float32),
        "w_head": jnp.pad(params["w_head"].astype(jnp.float32),
                          ((0, 0), (0, n_pad - n_classes))).astype(jnp.bfloat16),
        "b_head": jnp.pad(params["b_head"].astype(jnp.float32),
                          ((0, 0), (0, n_pad - n_classes))),
        "n_classes": n_classes,
        "n_pad": n_pad,
        "vocab_pad": vocab_pad,
    }
    # Materialize the prepared weights once so no cast/pad runs per forward.
    return jax.tree_util.tree_map(
        lambda x: jax.block_until_ready(x) if isinstance(x, jax.Array) else x,
        prepped)


# ----------------------------------------------------------------------------
# Wrapper: minimal XLA glue (im2col, id reshapes) + one pallas_call
# ----------------------------------------------------------------------------
def multimodal_forward(prepped, imgs, texts, atten_masks, token_type_ids):
    B, S = texts.shape
    n_classes = prepped["n_classes"]
    n_pad = prepped["n_pad"]
    vocab_pad = prepped["vocab_pad"]

    # Integer ids as tiny int32 VMEM columns (gather happens inside kernel).
    texts_flat = texts.astype(jnp.int32).reshape(B * S, 1)
    tt_flat = token_type_ids.astype(jnp.int32).reshape(B * S, 1)
    mask = atten_masks.astype(jnp.float32)                         # (B, S)

    # im2col glue: non-overlapping PATCHxPATCH patches from NCHW images,
    # flattened to a single 2-D matmul operand (B*P, C*ph*pw).
    _, C, H, W = imgs.shape
    ph = pw = PATCH
    x = imgs.astype(jnp.float32).reshape(B, C, H // ph, ph, W // pw, pw)
    x = x.transpose(0, 2, 4, 1, 3, 5)
    P = (H // ph) * (W // pw)
    D = C * ph * pw
    patches = x.reshape(B * P, D)                                  # (B*P, D)

    flops = (2 * (B * S) * vocab_pad * TEXT_HIDDEN              # one-hot gather
             + 2 * B * TEXT_HIDDEN * TEXT_HIDDEN                # pooler dense
             + 2 * (B * P) * D * VISION_HIDDEN                  # patch embed
             + 2 * B * (TEXT_HIDDEN + VISION_HIDDEN) * n_pad)   # head
    bytes_accessed = (texts_flat.size * 4 + tt_flat.size * 4 + mask.size * 4
                      + prepped["tok_emb"].size * 2
                      + prepped["type_emb"].size * 4
                      + patches.size * 4
                      + prepped["w_pool"].size * 2 + prepped["b_pool"].size * 4
                      + prepped["w_patch"].size * 2 + prepped["b_patch"].size * 4
                      + prepped["w_head"].size * 2 + prepped["b_head"].size * 4
                      + B * n_pad * 4)

    out_pad = pl.pallas_call(
        _fused_multimodal_kernel,
        out_shape=jax.ShapeDtypeStruct((B, n_pad), jnp.float32),
        grid=(1,),
        in_specs=[
            pl.BlockSpec((B * S, 1), lambda i: (0, 0)),
            pl.BlockSpec((B * S, 1), lambda i: (0, 0)),
            pl.BlockSpec((B, S), lambda i: (0, 0)),
            pl.BlockSpec((vocab_pad, TEXT_HIDDEN), lambda i: (0, 0)),
            pl.BlockSpec((N_TOKEN_TYPES, TEXT_HIDDEN), lambda i: (0, 0)),
            pl.BlockSpec((B * P, D), lambda i: (0, 0)),
            pl.BlockSpec((TEXT_HIDDEN, TEXT_HIDDEN), lambda i: (0, 0)),
            pl.BlockSpec((1, TEXT_HIDDEN), lambda i: (0, 0)),
            pl.BlockSpec((D, VISION_HIDDEN), lambda i: (0, 0)),
            pl.BlockSpec((1, VISION_HIDDEN), lambda i: (0, 0)),
            pl.BlockSpec((TEXT_HIDDEN + VISION_HIDDEN, n_pad),
                         lambda i: (0, 0)),
            pl.BlockSpec((1, n_pad), lambda i: (0, 0)),
        ],
        out_specs=pl.BlockSpec((B, n_pad), lambda i: (0, 0)),
        compiler_params=pltpu.CompilerParams(
            dimension_semantics=("arbitrary",)),
        cost_estimate=pl.CostEstimate(
            flops=flops,
            transcendentals=B * TEXT_HIDDEN + B,    # tanh + reciprocal
            bytes_accessed=bytes_accessed),
    )(texts_flat, tt_flat, mask,
      prepped["tok_emb"], prepped["type_emb"], patches,
      prepped["w_pool"], prepped["b_pool"],
      prepped["w_patch"], prepped["b_patch"],
      prepped["w_head"], prepped["b_head"])

    return out_pad[:, :n_classes]


# ----------------------------------------------------------------------------
# Main
# ----------------------------------------------------------------------------
if __name__ == "__main__":
    key = jax.random.PRNGKey(0)
    ks = jax.random.split(key, 9)

    B, S = 2, 8
    C, H, W = 3, 16, 16
    n_classes = 10
    patch_dim = C * PATCH * PATCH

    # Inputs (imgs in PyTorch NCHW layout).
    imgs = jax.random.normal(ks[0], (B, C, H, W), jnp.float32)
    texts = jax.random.randint(ks[1], (B, S), 0, VOCAB)
    atten_masks = (jax.random.uniform(ks[2], (B, S)) > 0.3).astype(jnp.float32)
    token_type_ids = jax.random.randint(ks[3], (B, S), 0, N_TOKEN_TYPES)

    # Deterministic parameters.
    params = {
        "tok_emb": 0.02 * jax.random.normal(
            ks[4], (VOCAB, TEXT_HIDDEN), jnp.float32),
        "type_emb": 0.02 * jax.random.normal(
            ks[5], (N_TOKEN_TYPES, TEXT_HIDDEN), jnp.float32),
        "w_pool": 0.02 * jax.random.normal(
            ks[6], (TEXT_HIDDEN, TEXT_HIDDEN), jnp.float32),
        "b_pool": jnp.zeros((1, TEXT_HIDDEN), jnp.float32),
        "w_patch": 0.02 * jax.random.normal(
            ks[7], (patch_dim, VISION_HIDDEN), jnp.float32),
        "b_patch": jnp.zeros((1, VISION_HIDDEN), jnp.float32),
        "w_head": 0.02 * jax.random.normal(
            ks[8], (TEXT_HIDDEN + VISION_HIDDEN, n_classes), jnp.float32),
        "b_head": jnp.zeros((1, n_classes), jnp.float32),
    }

    # One-time weight preparation (bf16 casts, padding) — not part of forward.
    prepped = prepare_params(params)

    out = multimodal_forward(prepped, imgs, texts, atten_masks, token_type_ids)
    out = jax.block_until_ready(out)
    assert out.shape == (B, n_classes) and out.dtype == jnp.float32
    assert bool(jnp.all(jnp.isfinite(out)))
    print("KERNEL_OK")
</pallas_src>

<mosaic_0001>
module attributes {stable_mosaic.version = 11 : i64} {
  func.func @_fused_multimodal_kernel(%arg0: i32, %arg1: memref<16x1xi32, #tpu.memory_space<vmem>>, %arg2: memref<16x1xi32, #tpu.memory_space<vmem>>, %arg3: memref<2x8xf32, #tpu.memory_space<vmem>>, %arg4: memref<128x768xbf16, #tpu.memory_space<vmem>>, %arg5: memref<2x768xf32, #tpu.memory_space<vmem>>, %arg6: memref<32x48xf32, #tpu.memory_space<vmem>>, %arg7: memref<768x768xbf16, #tpu.memory_space<vmem>>, %arg8: memref<1x768xf32, #tpu.memory_space<vmem>>, %arg9: memref<48x512xbf16, #tpu.memory_space<vmem>>, %arg10: memref<1x512xf32, #tpu.memory_space<vmem>>, %arg11: memref<1280x128xbf16, #tpu.memory_space<vmem>>, %arg12: memref<1x128xf32, #tpu.memory_space<vmem>>, %arg13: memref<2x128xf32, #tpu.memory_space<vmem>>) attributes {dimension_semantics = [#tpu.dimension_semantics<arbitrary>], iteration_bounds = array<i64: 1>, scalar_prefetch = 0 : i64, scratch_operands = 0 : i64, tpu.core_type = #tpu.core_type<tc>, window_params = [{pipeline_mode = #tpu.pipeline_mode<synchronous>, transform_indices = @transform_0, window_bounds = array<i64: 16, 1>}, {pipeline_mode = #tpu.pipeline_mode<synchronous>, transform_indices = @transform_1, window_bounds = array<i64: 16, 1>}, {pipeline_mode = #tpu.pipeline_mode<synchronous>, transform_indices = @transform_2, window_bounds = array<i64: 2, 8>}, {pipeline_mode = #tpu.pipeline_mode<synchronous>, transform_indices = @transform_3, window_bounds = array<i64: 128, 768>}, {pipeline_mode = #tpu.pipeline_mode<synchronous>, transform_indices = @transform_4, window_bounds = array<i64: 2, 768>}, {pipeline_mode = #tpu.pipeline_mode<synchronous>, transform_indices = @transform_5, window_bounds = array<i64: 32, 48>}, {pipeline_mode = #tpu.pipeline_mode<synchronous>, transform_indices = @transform_6, window_bounds = array<i64: 768, 768>}, {pipeline_mode = #tpu.pipeline_mode<synchronous>, transform_indices = @transform_7, window_bounds = array<i64: 1, 768>}, {pipeline_mode = #tpu.pipeline_mode<synchronous>, transform_indices = @transform_8, window_bounds = array<i64: 48, 512>}, {pipeline_mode = #tpu.pipeline_mode<synchronous>, transform_indices = @transform_9, window_bounds = array<i64: 1, 512>}, {pipeline_mode = #tpu.pipeline_mode<synchronous>, transform_indices = @transform_10, window_bounds = array<i64: 1280, 128>}, {pipeline_mode = #tpu.pipeline_mode<synchronous>, transform_indices = @transform_11, window_bounds = array<i64: 1, 128>}, {pipeline_mode = #tpu.pipeline_mode<synchronous>, transform_indices = @transform_12, window_bounds = array<i64: 2, 128>}]} {
    %c0 = arith.constant 0 : index
    %c0_0 = arith.constant 0 : index
    %0 = vector.load %arg1[%c0, %c0_0] : memref<16x1xi32, #tpu.memory_space<vmem>>, vector<16x1xi32>
    %1 = tpu.iota {dimensions = array<i32: 1>} : vector<16x128xi32>
    %2 = vector.broadcast %0 : vector<16x1xi32> to vector<16x128xi32>
    %3 = arith.cmpi eq, %2, %1 : vector<16x128xi32>
    %4 = arith.extui %3 : vector<16x128xi1> to vector<16x128xi32>
    %5 = arith.sitofp %4 : vector<16x128xi32> to vector<16x128xf32>
    %6 = arith.truncf %5 : vector<16x128xf32> to vector<16x128xbf16>
    %c0_1 = arith.constant 0 : index
    %c0_2 = arith.constant 0 : index
    %7 = vector.load %arg4[%c0_1, %c0_2] : memref<128x768xbf16, #tpu.memory_space<vmem>>, vector<128x768xbf16>
    %cst = arith.constant dense<0.000000e+00> : vector<16x768xf32>
    %8 = tpu.matmul %6, %7, %cst {dimension_numbers = #tpu.dot_dimension_numbers<[1], [0], [0], [1], [0, 0, 1, 1], [], []>} : vector<16x128xbf16>, vector<128x768xbf16>, vector<16x768xf32> -> vector<16x768xf32>
    %c0_3 = arith.constant 0 : index
    %c0_4 = arith.constant 0 : index
    %9 = vector.load %arg2[%c0_3, %c0_4] : memref<16x1xi32, #tpu.memory_space<vmem>>, vector<16x1xi32>
    %10 = arith.sitofp %9 : vector<16x1xi32> to vector<16x1xf32>
    %c0_5 = arith.constant 0 : index
    %c0_6 = arith.constant 0 : index
    %11 = vector.load %arg5[%c0_5, %c0_6] : memref<2x768xf32, #tpu.memory_space<vmem>>, vector<1x768xf32>
    %c1 = arith.constant 1 : index
    %c0_7 = arith.constant 0 : index
    %12 = vector.load %arg5[%c1, %c0_7] : memref<2x768xf32, #tpu.memory_space<vmem>>, vector<1x768xf32>
    %13 = vector.broadcast %11 : vector<1x768xf32> to vector<16x768xf32>
    %14 = arith.addf %8, %13 : vector<16x768xf32>
    %15 = arith.subf %12, %11 : vector<1x768xf32>
    %16 = vector.broadcast %10 : vector<16x1xf32> to vector<16x768xf32>
    %17 = vector.broadcast %15 : vector<1x768xf32> to vector<16x768xf32>
    %18 = arith.mulf %16, %17 : vector<16x768xf32>
    %19 = arith.addf %14, %18 : vector<16x768xf32>
    %c0_8 = arith.constant 0 : index
    %c0_9 = arith.constant 0 : index
    %20 = vector.load %arg3[%c0_8, %c0_9] : memref<2x8xf32, #tpu.memory_space<vmem>>, vector<2x8xf32>
    %21 = vector.shape_cast %19 : vector<16x768xf32> to vector<2x8x768xf32>
    %22 = vector.shape_cast %20 : vector<2x8xf32> to vector<2x8x1xf32>
    %23 = vector.broadcast %22 : vector<2x8x1xf32> to vector<2x8x768xf32>
    %24 = arith.mulf %21, %23 : vector<2x8x768xf32>
    %cst_10 = arith.constant dense<0.000000e+00> : vector<2x768xf32>
    %25 = vector.multi_reduction <add>, %24, %cst_10 [1] : vector<2x8x768xf32> to vector<2x768xf32>
    %cst_11 = arith.constant dense<0.000000e+00> : vector<2xf32>
    %26 = vector.multi_reduction <add>, %20, %cst_11 [1] : vector<2x8xf32> to vector<2xf32>
    %27 = vector.shape_cast %26 : vector<2xf32> to vector<2x1xf32>
    %cst_12 = arith.constant 1.000000e+00 : f32
    %28 = vector.broadcast %cst_12 : f32 to vector<2x1xf32>
    %29 = arith.maximumf %27, %28 : vector<2x1xf32>
    %30 = tpu.reciprocal %29 {approx = true} : vector<2x1xf32> -> vector<2x1xf32>
    %31 = vector.broadcast %30 : vector<2x1xf32> to vector<2x768xf32>
    %32 = arith.mulf %25, %31 : vector<2x768xf32>
    %33 = arith.truncf %32 : vector<2x768xf32> to vector<2x768xbf16>
    %c0_13 = arith.constant 0 : index
    %c0_14 = arith.constant 0 : index
    %34 = vector.load %arg7[%c0_13, %c0_14] : memref<768x768xbf16, #tpu.memory_space<vmem>>, vector<768x768xbf16>
    %cst_15 = arith.constant dense<0.000000e+00> : vector<2x768xf32>
    %35 = tpu.matmul %33, %34, %cst_15 {dimension_numbers = #tpu.dot_dimension_numbers<[1], [0], [0], [1], [0, 0, 1, 1], [], []>} : vector<2x768xbf16>, vector<768x768xbf16>, vector<2x768xf32> -> vector<2x768xf32>
    %c0_16 = arith.constant 0 : index
    %c0_17 = arith.constant 0 : index
    %36 = vector.load %arg8[%c0_16, %c0_17] : memref<1x768xf32, #tpu.memory_space<vmem>>, vector<1x768xf32>
    %37 = vector.broadcast %36 : vector<1x768xf32> to vector<2x768xf32>
    %38 = arith.addf %35, %37 : vector<2x768xf32>
    %39 = math.tanh %38 : vector<2x768xf32>
    %c0_18 = arith.constant 0 : index
    %c0_19 = arith.constant 0 : index
    %40 = vector.load %arg6[%c0_18, %c0_19] : memref<32x48xf32, #tpu.memory_space<vmem>>, vector<32x48xf32>
    %41 = arith.truncf %40 : vector<32x48xf32> to vector<32x48xbf16>
    %c0_20 = arith.constant 0 : index
    %c0_21 = arith.constant 0 : index
    %42 = vector.load %arg9[%c0_20, %c0_21] : memref<48x512xbf16, #tpu.memory_space<vmem>>, vector<48x512xbf16>
    %cst_22 = arith.constant dense<0.000000e+00> : vector<32x512xf32>
    %43 = tpu.matmul %41, %42, %cst_22 {dimension_numbers = #tpu.dot_dimension_numbers<[1], [0], [0], [1], [0, 0, 1, 1], [], []>} : vector<32x48xbf16>, vector<48x512xbf16>, vector<32x512xf32> -> vector<32x512xf32>
    %c0_23 = arith.constant 0 : index
    %c0_24 = arith.constant 0 : index
    %44 = vector.load %arg10[%c0_23, %c0_24] : memref<1x512xf32, #tpu.memory_space<vmem>>, vector<1x512xf32>
    %45 = vector.broadcast %44 : vector<1x512xf32> to vector<32x512xf32>
    %46 = arith.addf %43, %45 : vector<32x512xf32>
    %cst_25 = arith.constant 0.000000e+00 : f32
    %47 = vector.broadcast %cst_25 : f32 to vector<32x512xf32>
    %48 = arith.maximumf %46, %47 : vector<32x512xf32>
    %49 = vector.shape_cast %48 : vector<32x512xf32> to vector<2x16x512xf32>
    %cst_26 = arith.constant dense<0.000000e+00> : vector<2x512xf32>
    %50 = vector.multi_reduction <add>, %49, %cst_26 [1] : vector<2x16x512xf32> to vector<2x512xf32>
    %cst_27 = arith.constant 6.250000e-02 : f32
    %51 = vector.broadcast %cst_27 : f32 to vector<2x512xf32>
    %52 = arith.mulf %50, %51 : vector<2x512xf32>
    %c0_28 = arith.constant 0 : index
    %c0_29 = arith.constant 0 : index
    %53 = vector.load %arg11[%c0_28, %c0_29] : memref<1280x128xbf16, #tpu.memory_space<vmem>>, vector<768x128xbf16>
    %c768 = arith.constant 768 : index
    %c0_30 = arith.constant 0 : index
    %54 = vector.load %arg11[%c768, %c0_30] : memref<1280x128xbf16, #tpu.memory_space<vmem>>, vector<512x128xbf16>
    %55 = arith.truncf %39 : vector<2x768xf32> to vector<2x768xbf16>
    %cst_31 = arith.constant dense<0.000000e+00> : vector<2x128xf32>
    %56 = tpu.matmul %55, %53, %cst_31 {dimension_numbers = #tpu.dot_dimension_numbers<[1], [0], [0], [1], [0, 0, 1, 1], [], []>} : vector<2x768xbf16>, vector<768x128xbf16>, vector<2x128xf32> -> vector<2x128xf32>
    %57 = arith.truncf %52 : vector<2x512xf32> to vector<2x512xbf16>
    %cst_32 = arith.constant dense<0.000000e+00> : vector<2x128xf32>
    %58 = tpu.matmul %57, %54, %cst_32 {dimension_numbers = #tpu.dot_dimension_numbers<[1], [0], [0], [1], [0, 0, 1, 1], [], []>} : vector<2x512xbf16>, vector<512x128xbf16>, vector<2x128xf32> -> vector<2x128xf32>
    %59 = arith.addf %56, %58 : vector<2x128xf32>
    %c0_33 = arith.constant 0 : index
    %c0_34 = arith.constant 0 : index
    %60 = vector.load %arg12[%c0_33, %c0_34] : memref<1x128xf32, #tpu.memory_space<vmem>>, vector<1x128xf32>
    %61 = vector.broadcast %60 : vector<1x128xf32> to vector<2x128xf32>
    %62 = arith.addf %59, %61 : vector<2x128xf32>
    %c0_35 = arith.constant 0 : index
    %c0_36 = arith.constant 0 : index
    %63 = vector.load %arg13[%c0_35, %c0_36] : memref<2x128xf32, #tpu.memory_space<vmem>>, vector<2x128xf32>
    tpu.vector_store %arg13[%c0_35, %c0_36], %62 {strides = array<i32>} : memref<2x128xf32, #tpu.memory_space<vmem>>, vector<2x128xf32>,
    return
  }
  func.func @transform_0(%arg0: i32) -> (i32, i32) {
    %c0_i32 = arith.constant 0 : i32
    %c0_i32_0 = arith.constant 0 : i32
    %c0_i32_1 = arith.constant 0 : i32
    return %c0_i32, %c0_i32_0 : i32, i32
  }
  func.func @transform_1(%arg0: i32) -> (i32, i32) {
    %c0_i32 = arith.constant 0 : i32
    %c0_i32_0 = arith.constant 0 : i32
    %c0_i32_1 = arith.constant 0 : i32
    return %c0_i32, %c0_i32_0 : i32, i32
  }
  func.func @transform_2(%arg0: i32) -> (i32, i32) {
    %c0_i32 = arith.constant 0 : i32
    %c0_i32_0 = arith.constant 0 : i32
    %c0_i32_1 = arith.constant 0 : i32
    return %c0_i32, %c0_i32_0 : i32, i32
  }
  func.func @transform_3(%arg0: i32) -> (i32, i32) {
    %c0_i32 = arith.constant 0 : i32
    %c0_i32_0 = arith.constant 0 : i32
    %c0_i32_1 = arith.constant 0 : i32
    return %c0_i32, %c0_i32_0 : i32, i32
  }
  func.func @transform_4(%arg0: i32) -> (i32, i32) {
    %c0_i32 = arith.constant 0 : i32
    %c0_i32_0 = arith.constant 0 : i32
    %c0_i32_1 = arith.constant 0 : i32
    return %c0_i32, %c0_i32_0 : i32, i32
  }
  func.func @transform_5(%arg0: i32) -> (i32, i32) {
    %c0_i32 = arith.constant 0 : i32
    %c0_i32_0 = arith.constant 0 : i32
    %c0_i32_1 = arith.constant 0 : i32
    return %c0_i32, %c0_i32_0 : i32, i32
  }
  func.func @transform_6(%arg0: i32) -> (i32, i32) {
    %c0_i32 = arith.constant 0 : i32
    %c0_i32_0 = arith.constant 0 : i32
    %c0_i32_1 = arith.constant 0 : i32
    return %c0_i32, %c0_i32_0 : i32, i32
  }
  func.func @transform_7(%arg0: i32) -> (i32, i32) {
    %c0_i32 = arith.constant 0 : i32
    %c0_i32_0 = arith.constant 0 : i32
    %c0_i32_1 = arith.constant 0 : i32
    return %c0_i32, %c0_i32_0 : i32, i32
  }
  func.func @transform_8(%arg0: i32) -> (i32, i32) {
    %c0_i32 = arith.constant 0 : i32
    %c0_i32_0 = arith.constant 0 : i32
    %c0_i32_1 = arith.constant 0 : i32
    return %c0_i32, %c0_i32_0 : i32, i32
  }
  func.func @transform_9(%arg0: i32) -> (i32, i32) {
    %c0_i32 = arith.constant 0 : i32
    %c0_i32_0 = arith.constant 0 : i32
    %c0_i32_1 = arith.constant 0 : i32
    return %c0_i32, %c0_i32_0 : i32, i32
  }
  func.func @transform_10(%arg0: i32) -> (i32, i32) {
    %c0_i32 = arith.constant 0 : i32
    %c0_i32_0 = arith.constant 0 : i32
    %c0_i32_1 = arith.constant 0 : i32
    return %c0_i32, %c0_i32_0 : i32, i32
  }
  func.func @transform_11(%arg0: i32) -> (i32, i32) {
    %c0_i32 = arith.constant 0 : i32
    %c0_i32_0 = arith.constant 0 : i32
    %c0_i32_1 = arith.constant 0 : i32
    return %c0_i32, %c0_i32_0 : i32, i32
  }
  func.func @transform_12(%arg0: i32) -> (i32, i32) {
    %c0_i32 = arith.constant 0 : i32
    %c0_i32_0 = arith.constant 0 : i32
    %c0_i32_1 = arith.constant 0 : i32
    return %c0_i32, %c0_i32_0 : i32, i32
  }
}

</mosaic_0001>

<bundles_post_ra>
// kernel: tpu_custom_call.1
= control target key start
LH: loop header
LB: loop body
LE: loop exit
PB: predicated region body
PF: predicated region fallthrough
CT: control target
= control target key end

     0   :  { %17 = vsyncpa [#allocation3], 0  ;;  %s6030_s0 = inlined_call_operand.vmem [shape: s32[16,1], index: 0, kind: input, shape index: {}]   ;;  %s6031_s1 = inlined_call_operand.vmem [shape: s32[16,1], index: 1, kind: input, shape index: {}]   ;;  %s6032_s2 = inlined_call_operand.hbm [shape: f32[2,8], index: 2, kind: input, shape index: {}]   ;;  %s6033_s3 = inlined_call_operand.hbm [shape: bf16[128,768], index: 3, kind: input, shape index: {}]   ;;  %s6034_s4 = inlined_call_operand.hbm [shape: f32[2,768], index: 4, kind: input, shape index: {}]   ;;  %s6035_s5 = inlined_call_operand.hbm [shape: f32[32,48], index: 5, kind: input, shape index: {}]   ;;  %s6036_s6 = inlined_call_operand.hbm [shape: bf16[768,768], index: 6, kind: input, shape index: {}]   ;;  %s6037_s7 = inlined_call_operand.hbm [shape: f32[1,768], index: 7, kind: input, shape index: {}]   ;;  %s6038_s8 = inlined_call_operand.hbm [shape: bf16[48,512], index: 8, kind: input, shape index: {}]   ;;  %s6039_s9 = inlined_call_operand.hbm [shape: f32[1,512], index: 9, kind: input, shape index: {}]   ;;  %s6040_s10 = inlined_call_operand.hbm [shape: bf16[1280,128], index: 10, kind: input, shape index: {}]   ;;  %s6041_s11 = inlined_call_operand.hbm [shape: f32[1,128], index: 11, kind: input, shape index: {}]   ;;  %s6042_s12 = inlined_call_operand.hbm [shape: f32[2,128], index: 12, kind: output, shape index: {}]  }
   0x1   :  { %18 = vsyncpa [#allocation6], 0 }
   0x2   :  { %19 = vsyncpa [#allocation9], 0 }
   0x3   :  { %20 = vsyncpa [#allocation12], 0 }
   0x4   :  { %21 = vsyncpa [#allocation15], 0 }
   0x5   :  { %22 = vsyncpa [#allocation18], 0 }
   0x6   :  { %23 = vsyncpa [#allocation4], 0  ;;  %s5653_s21 = smov [#allocation5]  }
   0x7   :  { %s43_s22 = sshll.u32 %s5653_s21, 4  ;;  %s44_s22 = int_to_ptr.vmem [resolvable:$true] %s43_s22 }
   0x8   :  { %s5427_s23 = scalar_lea.vmem %s44_s22, 6144  ;;  %p5432_p1 = scmp.lt.s32.totalorder %s44_s22, %s44_s22 }
   0x9   :  { %p5428_p0 = scmp.ne.s32.totalorder %s44_s22, %s5427_s23  ;;  %p5433_p2 = scmp.lt.s32.totalorder %s5427_s23, %s5427_s23 }
   0xb   :  { %p5434_p3 = por %p5433_p2, %p5432_p1 }
   0xd   :  { %p5435_p4 = pnand %p5434_p3, %p5428_p0 }
   0xf   :  { %5438 = shalt.err (!%p5435_p4)
}
  0x10   :  { %s5654_s24 = smov 384   ;;  %s5655_s25 = smov 24  }
  0x11   :  { %49 = dma.hbm_to_vmem [thread:$0]  %s6033_s3, 6144, %s44_s22, [#allocation6], %s5654_s24, %s5654_s24, %s5655_s25  }
  0x12   :  { %s5656_s28 = smov [#allocation8]  }
  0x13   :  { %s65_s29 = sshll.u32 %s5656_s28, 4  ;;  %s66_s29 = int_to_ptr.vmem [resolvable:$true] %s65_s29 }
  0x14   :  { %s5447_s30 = scalar_lea.vmem %s66_s29, 512  ;;  %p5452_p6 = scmp.lt.s32.totalorder %s66_s29, %s66_s29 }
  0x15   :  { %p5448_p5 = scmp.ne.s32.totalorder %s66_s29, %s5447_s30  ;;  %p5453_p7 = scmp.lt.s32.totalorder %s5447_s30, %s5447_s30 }
  0x17   :  { %p5454_p8 = por %p5453_p7, %p5452_p6 }
  0x19   :  { %p5455_p9 = pnand %p5454_p8, %p5448_p5 }
  0x1b   :  { %5458 = shalt.err (!%p5455_p9)
}
  0x1c   :  { %s5657_s13 = smov 128   ;;  %s5658_s14 = smov 8  }
  0x1d   :  { %71 = dma.hbm_to_vmem [thread:$0]  %s6035_s5, 512, %s66_s29, [#allocation9], %s5657_s13, %s5657_s13, %s5658_s14  }
  0x1e   :  { %s5659_s17 = smov [#allocation11]   ;;  %s5660_s19 = smov [#allocation14]  }
  0x1f   :  { %s90_s18 = sshll.u32 %s5659_s17, 4  ;;  %s112_s3 = sshll.u32 %s5660_s19, 4  ;;  %s91_s18 = int_to_ptr.vmem [resolvable:$true] %s90_s18  ;;  %s113_s3 = int_to_ptr.vmem [resolvable:$true] %s112_s3 }
  0x20   :  { %s5467_s20 = scalar_lea.vmem %s91_s18, 96  ;;  %p5472_p11 = scmp.lt.s32.totalorder %s91_s18, %s91_s18 }
  0x21   :  { %p5468_p10 = scmp.ne.s32.totalorder %s91_s18, %s5467_s20  ;;  %p5473_p12 = scmp.lt.s32.totalorder %s5467_s20, %s5467_s20 }
  0x23   :  { %p5474_p13 = por %p5473_p12, %p5472_p11 }
  0x25   :  { %p5475_p0 = pnand %p5474_p13, %p5468_p10 }
  0x27   :  { %5478 = shalt.err (!%p5475_p0)
}
  0x28   :  { %93 = dma.hbm_to_vmem [thread:$0]  %s6037_s7, 96, %s91_s18, [#allocation12]  }
  0x29   :  { %s5487_s23 = scalar_lea.vmem %s113_s3, 64  ;;  %p5492_p2 = scmp.lt.s32.totalorder %s113_s3, %s113_s3 }
  0x2a   :  { %p5488_p1 = scmp.ne.s32.totalorder %s113_s3, %s5487_s23  ;;  %p5493_p3 = scmp.lt.s32.totalorder %s5487_s23, %s5487_s23 }
  0x2c   :  { %p5494_p4 = por %p5493_p3, %p5492_p2 }
  0x2e   :  { %p5495_p5 = pnand %p5494_p4, %p5488_p1 }
  0x30   :  { %5498 = shalt.err (!%p5495_p5)
}
  0x31   :  { %115 = dma.hbm_to_vmem [thread:$0]  %s6039_s9, 64, %s113_s3, [#allocation15]  }
  0x32   :  { %s5661_s27 = smov [#allocation2]   ;;  %s5662_s29 = smov [#allocation7]  }
  0x33   :  { %s34_s28 = sshll.u32 %s5661_s27, 4  ;;  %s56_s30 = sshll.u32 %s5662_s29, 4  ;;  %s35_s28 = int_to_ptr.vmem [resolvable:$true] %s34_s28  ;;  %s57_s30 = int_to_ptr.vmem [resolvable:$true] %s56_s30 }
  0x34   :  { %s5507_s13 = scalar_lea.vmem %s35_s28, 32  ;;  %p5512_p7 = scmp.lt.s32.totalorder %s35_s28, %s35_s28 }
  0x35   :  { %p5508_p6 = scmp.ne.s32.totalorder %s35_s28, %s5507_s13  ;;  %p5513_p8 = scmp.lt.s32.totalorder %s5507_s13, %s5507_s13 }
  0x37   :  { %p5514_p9 = por %p5513_p8, %p5512_p7 }
  0x39   :  { %p5515_p10 = pnand %p5514_p9, %p5508_p6 }
  0x3b   :  { %5518 = shalt.err (!%p5515_p10)
}
  0x3c   :  { %37 = dma.hbm_to_vmem [thread:$0]  %s6032_s2, 32, %s35_s28, [#allocation3]  }
  0x3d   :  { %s5527_s15 = scalar_lea.vmem %s57_s30, 192  ;;  %p5532_p12 = scmp.lt.s32.totalorder %s57_s30, %s57_s30 }
  0x3e   :  { %p5528_p11 = scmp.ne.s32.totalorder %s57_s30, %s5527_s15  ;;  %p5533_p13 = scmp.lt.s32.totalorder %s5527_s15, %s5527_s15 }
  0x40   :  { %p5534_p0 = por %p5533_p13, %p5532_p12 }
  0x42   :  { %p5535_p1 = pnand %p5534_p0, %p5528_p11 }
  0x44   :  { %5538 = shalt.err (!%p5535_p1)
}
  0x45   :  { %59 = dma.hbm_to_vmem [thread:$0]  %s6034_s4, 192, %s57_s30, [#allocation6]  }
  0x46   :  { %s5663_s17 = smov [#allocation10]   ;;  %s5664_s19 = smov [#allocation13]  }
  0x47   :  { %s77_s18 = sshll.u32 %s5663_s17, 4  ;;  %s99_s3 = sshll.u32 %s5664_s19, 4  ;;  %s78_s18 = int_to_ptr.vmem [resolvable:$true] %s77_s18  ;;  %s100_s3 = int_to_ptr.vmem [resolvable:$true] %s99_s3 }
  0x48   :  { %s5547_s20 = scalar_lea.vmem %s78_s18, 36864  ;;  %p5552_p3 = scmp.lt.s32.totalorder %s78_s18, %s78_s18 }
  0x49   :  { %p5548_p2 = scmp.ne.s32.totalorder %s78_s18, %s5547_s20  ;;  %p5553_p4 = scmp.lt.s32.totalorder %s5547_s20, %s5547_s20 }
  0x4b   :  { %p5554_p5 = por %p5553_p4, %p5552_p3 }
  0x4d   :  { %p5555_p6 = pnand %p5554_p5, %p5548_p2 }
  0x4f   :  { %5558 = shalt.err (!%p5555_p6)
}
  0x50   :  { %83 = dma.hbm_to_vmem [thread:$0]  %s6036_s6, 36864, %s78_s18, [#allocation9], %s5654_s24, %s5654_s24, %s5655_s25  }
  0x51   :  { %s5567_s4 = scalar_lea.vmem %s100_s3, 1536  ;;  %p5572_p8 = scmp.lt.s32.totalorder %s100_s3, %s100_s3 }
  0x52   :  { %p5568_p7 = scmp.ne.s32.totalorder %s100_s3, %s5567_s4  ;;  %p5573_p9 = scmp.lt.s32.totalorder %s5567_s4, %s5567_s4 }
  0x54   :  { %p5574_p10 = por %p5573_p9, %p5572_p8 }
  0x56   :  { %p5575_p11 = pnand %p5574_p10, %p5568_p7 }
  0x58   :  { %5578 = shalt.err (!%p5575_p11)
}
  0x59   :  { %s5665_s22 = smov 256   ;;  %s5666_s23 = smov 16  }
  0x5a   :  { %105 = dma.hbm_to_vmem [thread:$0]  %s6038_s8, 1536, %s100_s3, [#allocation12], %s5665_s22, %s5665_s22, %s5666_s23  }
  0x5b   :  { %s5667_s27 = smov [#allocation16]  }
  0x5c   :  { %s121_s28 = sshll.u32 %s5667_s27, 4  ;;  %s122_s28 = int_to_ptr.vmem [resolvable:$true] %s121_s28 }
  0x5d   :  { %s5587_s29 = scalar_lea.vmem %s122_s28, 10240  ;;  %p5592_p13 = scmp.lt.s32.totalorder %s122_s28, %s122_s28 }
  0x5e   :  { %p5588_p12 = scmp.ne.s32.totalorder %s122_s28, %s5587_s29  ;;  %p5593_p0 = scmp.lt.s32.totalorder %s5587_s29, %s5587_s29 }
  0x60   :  { %p5594_p1 = por %p5593_p0, %p5592_p13 }
  0x62   :  { %p5595_p2 = pnand %p5594_p1, %p5588_p12 }
  0x64   :  { %5598 = shalt.err (!%p5595_p2)
}
  0x65   :  { %s5668_s6 = smov 64   ;;  %s5669_s24 = smov 4  }
  0x66   :  { %127 = dma.hbm_to_vmem [thread:$0]  %s6040_s10, 10240, %s122_s28, [#allocation15], %s5668_s6, %s5668_s6, %s5669_s24  }
  0x67   :  { %s5670_s13 = smov [#allocation17]  }
  0x68   :  { %s134_s7 = sshll.u32 %s5670_s13, 4  ;;  %s135_s7 = int_to_ptr.vmem [resolvable:$true] %s134_s7 }
  0x69   :  { %s5607_s8 = scalar_lea.vmem %s135_s7, 16  ;;  %s5611_s14 = scalar_lea.vmem %s135_s7, 32 }
  0x6a   :  { %p5608_p3 = scmp.ne.s32.totalorder %s135_s7, %s5607_s8  ;;  %p5612_p4 = scmp.lt.s32.totalorder %s135_s7, %s135_s7 }
  0x6b   :  { %p5613_p5 = scmp.lt.s32.totalorder %s5611_s14, %s5607_s8 }
  0x6d   :  { %p5614_p6 = por %p5613_p5, %p5612_p4 }
  0x6f   :  { %p5615_p7 = pnand %p5614_p6, %p5608_p3 }
  0x71   :  { %5618 = shalt.err (!%p5615_p7)
}
  0x72   :  { %137 = dma.hbm_to_vmem [thread:$0]  %s6041_s11, 16, %s135_s7, [#allocation18]  }
  0x73   :  { %5639 = dma.done.wait [#allocation3], 32  }
  0x74   :  { %5640 = vsyncadd [#allocation3], 4294967264 }
  0x75   :  { %5641 = dma.done.wait [#allocation6], 6336  }
  0x76   :  { %5642 = vsyncadd [#allocation6], 4294960960 }
  0x77   :  { %5643 = dma.done.wait [#allocation9], 37376  }
  0x78   :  { %5644 = vsyncadd [#allocation9], 4294929920 }
  0x79   :  { %5645 = dma.done.wait [#allocation12], 1632  }
  0x7a   :  { %5646 = vsyncadd [#allocation12], 4294965664 }
  0x7b   :  { %5647 = dma.done.wait [#allocation15], 10304  }
  0x7c   :  { %5648 = vsyncadd [#allocation15], 4294956992 }
  0x7d   :  { %5649 = dma.done.wait [#allocation18], 16  }
  0x7e   :  { %5650 = vsyncadd [#allocation18], 4294967280  ;;  %v5671_v0 = vmov 0   ;;  %v169_v1 = vld [vmem:[%s6030_s0] sm:$0xff]  ;;  %v170_v2 = vld [vmem:[%s6030_s0 + $0x8] sm:$0xff]  ;;  %v171_v35 = vlaneseq  ;;  %vm806_vm0 = vcmask 58368  }
  0x7f   :  { %4800 = vset.pattern.permute.xlu0 %v5671_v0  ;;  %544 = vmatprep.mubr.bf16.mxu0 %v5671_v0  ;;  %v234_v3 = vld [vmem:[%s6031_s1] sm:$0xff]  ;;  %v4802_v4 = vld [vmem:[#allocation5 + $0x154] ss:$24 sps:$4 sm:$0xff]   ;;  %v4804_v5 = vld [vmem:[#allocation5 + $0x150] ss:$24 sps:$4 sm:$0xff]   ;;  %vm1185_vm4 = vcmask 1041409  }
  0x80   :  { %587 = vmatprep.mubr.bf16.mxu1 %v5671_v0  ;;  %4801 = vset.pattern.permute.xlu1 %v5671_v0  ;;  %v4805_v6 = vld [vmem:[#allocation5 + $0x15c] ss:$24 sps:$4 sm:$0xff]   ;;  %v4807_v7 = vld [vmem:[#allocation5 + $0x158] ss:$24 sps:$4 sm:$0xff]   ;;  %v236_v10 = vcvt.s32.f32 %v234_v3  ;;  %v4811_v11 = vld [vmem:[#allocation5 + $0x12c] ss:$24 sps:$4 sm:$0xff]  }
  0x81   :  { %174 = vperm.xlu0 %4800, %v169_v1   ;;  %512 = vmatprep.subr.bf16.mxu0 %v4802_v4  ;;  %v4808_v8 = vld [vmem:[#allocation5 + $0x124] ss:$24 sps:$4 sm:$0xff]   ;;  %v4810_v9 = vld [vmem:[#allocation5 + $0x120] ss:$24 sps:$4 sm:$0xff]   ;;  %v4814_v13 = vld [vmem:[#allocation5 + $0xf4] ss:$24 sps:$4 sm:$0xff]  }
  0x82   :  { %513 = vmatpush1.bf16.msra.mxu0 %v4804_v5  ;;  %555 = vmatprep.subr.bf16.mxu1 %v4805_v6  ;;  %v4813_v12 = vld [vmem:[#allocation5 + $0x128] ss:$24 sps:$4 sm:$0xff]   ;;  %v4817_v15 = vld [vmem:[#allocation5 + $0xfc] ss:$24 sps:$4 sm:$0xff]   ;;  %v4819_v17 = vld [vmem:[#allocation5 + $0xf8] ss:$24 sps:$4 sm:$0xff]  }
  0x83   :  { %556 = vmatpush1.bf16.msra.mxu1 %v4807_v7  ;;  %514 = vmatprep.subr.bf16.mxu0 %v4808_v8  ;;  %v4816_v14 = vld [vmem:[#allocation5 + $0xf0] ss:$24 sps:$4 sm:$0xff]   ;;  %v4820_v16 = vld [vmem:[#allocation5 + $0xc4] ss:$24 sps:$4 sm:$0xff]   ;;  %v4822_v19 = vld [vmem:[#allocation5 + $0xc0] ss:$24 sps:$4 sm:$0xff]  }
  0x84   :  { %557 = vmatprep.subr.bf16.mxu1 %v4811_v11  ;;  %v4823_v18 = vld [vmem:[#allocation5 + $0xcc] ss:$24 sps:$4 sm:$0xff]   ;;  %v4825_v21 = vld [vmem:[#allocation5 + $0xc8] ss:$24 sps:$4 sm:$0xff]   ;;  %v4829_v22 = vld [vmem:[#allocation5 + $0x9c] ss:$24 sps:$4 sm:$0xff]  }
  0x85   :  { %177 = vperm.xlu0 %4800, %v170_v2   ;;  %v4826_v20 = vld [vmem:[#allocation5 + $0x94] ss:$24 sps:$4 sm:$0xff]   ;;  %v4828_v23 = vld [vmem:[#allocation5 + $0x90] ss:$24 sps:$4 sm:$0xff]   ;;  %v4832_v24 = vld [vmem:[#allocation5 + $0x64] ss:$24 sps:$4 sm:$0xff]  }
  0x86   :  { %515 = vmatpush1.bf16.msra.mxu0 %v4810_v9  ;;  %v4831_v25 = vld [vmem:[#allocation5 + $0x98] ss:$24 sps:$4 sm:$0xff]   ;;  %v4835_v26 = vld [vmem:[#allocation5 + $0x6c] ss:$24 sps:$4 sm:$0xff]   ;;  %v4837_v29 = vld [vmem:[#allocation5 + $0x68] ss:$24 sps:$4 sm:$0xff]  }
  0x87   :  { %516 = vmatprep.subr.bf16.mxu0 %v4814_v13  ;;  %558 = vmatpush1.bf16.msra.mxu1 %v4813_v12  ;;  %v4834_v27 = vld [vmem:[#allocation5 + $0x60] ss:$24 sps:$4 sm:$0xff]   ;;  %v4838_v28 = vld [vmem:[#allocation5 + $0x34] ss:$24 sps:$4 sm:$0xff]   ;;  %v4840_v31 = vld [vmem:[#allocation5 + $0x30] ss:$24 sps:$4 sm:$0xff]  }
  0x88   :  { %559 = vmatprep.subr.bf16.mxu1 %v4817_v15  ;;  %v4841_v30 = vld [vmem:[#allocation5 + $0x3c] ss:$24 sps:$4 sm:$0xff]   ;;  %v4843_v33 = vld [vmem:[#allocation5 + $0x38] ss:$24 sps:$4 sm:$0xff]   ;;  %v4847_v34 = vld [vmem:[#allocation5 + $0xc] ss:$24 sps:$4 sm:$0xff]  }
  0x89   :  { %644 = vperm.xlu0 %4800, %v236_v10   ;;  %v4844_v32 = vld [vmem:[#allocation5 + $0x4] ss:$24 sps:$4 sm:$0xff]   ;;  %v4846_v36 = vld [vmem:[#allocation5] ss:$24 sps:$4 sm:$0xff]   ;;  %v5788_v38 = vshrl.u32 %v171_v35, 7  ;;  %v172_v52 = vand.u32 127, %v171_v35 }
  0x8a   :  { %517 = vmatpush1.bf16.msra.mxu0 %v4816_v14  ;;  %v4852_v37 = vld [vmem:[#allocation5 + $0x164] ss:$24 sps:$4 sm:$0xff]   ;;  %v4849_v39 = vld [vmem:[#allocation5 + $0x8] ss:$24 sps:$4 sm:$0xff]   ;;  %v4855_v56 = vld [vmem:[#allocation5 + $0x134] ss:$24 sps:$4 sm:$0xff]  }
  0x8b   :  { %518 = vmatprep.subr.bf16.mxu0 %v4820_v16  ;;  %560 = vmatpush1.bf16.msra.mxu1 %v4819_v17  ;;  %v5791_v40 = vsub.s32 1, %v5788_v38  ;;  %v707_v41 = vld [vmem:[#allocation2] sm:$0x3]  ;;  %v5795_v44 = vsub.s32 0, %v5788_v38  ;;  %v4876_v45 = vld [vmem:[#allocation10 + $0x154] ss:$24 sps:$4 sm:$0xff]  }
  0x8c   :  { %561 = vmatprep.subr.bf16.mxu1 %v4823_v18  ;;  %v807_v42 = vsel %vm806_vm0, %v707_v41, 0.0  ;;  %v235_v47 = vld [vmem:[%s6031_s1 + $0x8] sm:$0xff]  ;;  %v4850_v53 = vld [vmem:[#allocation5 + $0x160] ss:$24 sps:$4 sm:$0xff]   ;;  %v5807_v55 = vsub.s32 4, %v5788_v38  ;;  %vm3124_vm5 = vcmask 392192  }
  0x8d   :  { %v718_v43 = vrot.slane %v707_v41, %v5791_v40  ;;  %808 = vadd.xlane.f32.xlu1 %v807_v42  ;;  %v711_v46 = vrot.slane %v707_v41, %v5795_v44  ;;  %v237_v48 = vcvt.s32.f32 %v235_v47  ;;  %v5801_v49 = vld [vmem:[#allocation7] ss:$2 sm:$0x3f]  ;;  %v240_v50 = vld [vmem:[#allocation7 + $0x1] ss:$2 sm:$0x3f] }
  0x8e   :  { %519 = vmatpush1.bf16.msra.mxu0 %v4822_v19  ;;  %v5804_v54 = vsub.f32 %v240_v50, %v5801_v49  ;;  %v4874_v57 = vld [vmem:[#allocation10 + $0x150] ss:$24 sps:$4 sm:$0xff]   ;;  %v4882_v59 = vld [vmem:[#allocation10 + $0x124] ss:$24 sps:$4 sm:$0xff]   ;;  %v5672_v63 = vmov 1.0|1.0  }
  0x8f   :  { %520 = vmatprep.subr.bf16.mxu0 %v4826_v20  ;;  %562 = vmatpush1.bf16.msra.mxu1 %v4825_v21  ;;  %v4853_v61 = vld [vmem:[#allocation5 + $0x130] ss:$24 sps:$4 sm:$0xff]   ;;  %v4858_v1 = vld [vmem:[#allocation5 + $0x104] ss:$24 sps:$4 sm:$0xff]   ;;  %v4888_v4 = vld [vmem:[#allocation10 + $0xf4] ss:$24 sps:$4 sm:$0xff]  }
  0x90   :  { %563 = vmatprep.subr.bf16.mxu1 %v4829_v22  ;;  %720 = vbcast.lane.b32.xlu0 %v718_v43, 256  ;;  %v5815_v62 = vrot.slane %v5804_v54, %v5807_v55  ;;  %v4880_v2 = vld [vmem:[#allocation10 + $0x120] ss:$24 sps:$4 sm:$0xff]   ;;  %v4856_v5 = vld [vmem:[#allocation5 + $0x100] ss:$24 sps:$4 sm:$0xff]   ;;  %s5673_s1 = smov [#allocation19]  }
  0x91   :  { %v4861_v7 = vld [vmem:[#allocation5 + $0xd4] ss:$24 sps:$4 sm:$0xff]   ;;  %v4894_v9 = vld [vmem:[#allocation10 + $0xc4] ss:$24 sps:$4 sm:$0xff]   ;;  %v4864_v11 = vld [vmem:[#allocation5 + $0xa4] ss:$24 sps:$4 sm:$0xff]  }
  0x92   :  { %521 = vmatpush1.bf16.msra.mxu0 %v4828_v23  ;;  %v4886_v8 = vld [vmem:[#allocation10 + $0xf0] ss:$24 sps:$4 sm:$0xff]   ;;  %v4859_v10 = vld [vmem:[#allocation5 + $0xd0] ss:$24 sps:$4 sm:$0xff]   ;;  %v4892_v12 = vld [vmem:[#allocation10 + $0xc0] ss:$24 sps:$4 sm:$0xff]  }
  0x93   :  { %522 = vmatprep.subr.bf16.mxu0 %v4832_v24  ;;  %564 = vmatpush1.bf16.msra.mxu1 %v4831_v25  ;;  %v4900_v13 = vld [vmem:[#allocation10 + $0x94] ss:$24 sps:$4 sm:$0xff]   ;;  %v4867_v15 = vld [vmem:[#allocation5 + $0x74] ss:$24 sps:$4 sm:$0xff]   ;;  %v4906_v17 = vld [vmem:[#allocation10 + $0x64] ss:$24 sps:$4 sm:$0xff]  }
  0x94   :  { %565 = vmatprep.subr.bf16.mxu1 %v4835_v26  ;;  %713 = vbcast.lane.b32.xlu0 %v711_v46, 256  ;;  %v4862_v14 = vld [vmem:[#allocation5 + $0xa0] ss:$24 sps:$4 sm:$0xff]   ;;  %v4898_v16 = vld [vmem:[#allocation10 + $0x90] ss:$24 sps:$4 sm:$0xff]   ;;  %s4214_s20 = sshll.u32 %s5673_s1, 4  ;;  %s4215_s20 = int_to_ptr.vmem [resolvable:$true] %s4214_s20 }
  0x95   :  { %v4865_v18 = vld [vmem:[#allocation5 + $0x70] ss:$24 sps:$4 sm:$0xff]   ;;  %v4870_v19 = vld [vmem:[#allocation5 + $0x44] ss:$24 sps:$4 sm:$0xff]   ;;  %v4912_v21 = vld [vmem:[#allocation10 + $0x34] ss:$24 sps:$4 sm:$0xff]   ;;  %p5624_p9 = scmp.lt.s32.totalorder %s4215_s20, %s4215_s20 }
  0x96   :  { %523 = vmatpush1.bf16.msra.mxu0 %v4834_v27  ;;  %v4904_v20 = vld [vmem:[#allocation10 + $0x60] ss:$24 sps:$4 sm:$0xff]   ;;  %v4868_v22 = vld [vmem:[#allocation5 + $0x40] ss:$24 sps:$4 sm:$0xff]   ;;  %v4910_v24 = vld [vmem:[#allocation10 + $0x30] ss:$24 sps:$4 sm:$0xff]  }
  0x97   :  { %524 = vmatprep.subr.bf16.mxu0 %v4838_v28  ;;  %566 = vmatpush1.bf16.msra.mxu1 %v4837_v29  ;;  %v4873_v23 = vld [vmem:[#allocation5 + $0x14] ss:$24 sps:$4 sm:$0xff]   ;;  %v4871_v25 = vld [vmem:[#allocation5 + $0x10] ss:$24 sps:$4 sm:$0xff]   ;;  %v4879_v26 = vld [vmem:[#allocation10 + $0x454] ss:$24 sps:$4 sm:$0xff]  }
  0x98   :  { %567 = vmatprep.subr.bf16.mxu1 %v4841_v30  ;;  %v4877_v27 = vld [vmem:[#allocation10 + $0x450] ss:$24 sps:$4 sm:$0xff]   ;;  %v4885_v28 = vld [vmem:[#allocation10 + $0x424] ss:$24 sps:$4 sm:$0xff]   ;;  %v4883_v29 = vld [vmem:[#allocation10 + $0x420] ss:$24 sps:$4 sm:$0xff]  }
  0x99   :  { %v4891_v30 = vld [vmem:[#allocation10 + $0x3f4] ss:$24 sps:$4 sm:$0xff]   ;;  %v4901_v35 = vld [vmem:[#allocation10 + $0x390] ss:$24 sps:$4 sm:$0xff]   ;;  %v4918_v42 = vld [vmem:[#allocation10 + $0x4] ss:$24 sps:$4 sm:$0xff]  }
  0x9a   :  { %525 = vmatpush1.bf16.msra.mxu0 %v4840_v31  ;;  %v4889_v31 = vld [vmem:[#allocation10 + $0x3f0] ss:$24 sps:$4 sm:$0xff]   ;;  %v4921_v43 = vld [vmem:[#allocation10 + $0x304] ss:$24 sps:$4 sm:$0xff]   ;;  %v4919_v46 = vld [vmem:[#allocation10 + $0x300] ss:$24 sps:$4 sm:$0xff]  }
  0x9b   :  { %526 = vmatprep.subr.bf16.mxu0 %v4844_v32  ;;  %568 = vmatpush1.bf16.msra.mxu1 %v4843_v33  ;;  %v4897_v32 = vld [vmem:[#allocation10 + $0x3c4] ss:$24 sps:$4 sm:$0xff]   ;;  %v4895_v33 = vld [vmem:[#allocation10 + $0x3c0] ss:$24 sps:$4 sm:$0xff]   ;;  %v4913_v41 = vld [vmem:[#allocation10 + $0x330] ss:$24 sps:$4 sm:$0xff]  }
  0x9c   :  { %569 = vmatprep.subr.bf16.mxu1 %v4847_v34  ;;  %v4903_v34 = vld [vmem:[#allocation10 + $0x394] ss:$24 sps:$4 sm:$0xff]   ;;  %s5619_s2 = scalar_lea.vmem %s4215_s20, 32 }
  0x9d   :  { %v4927_v50 = vld [vmem:[#allocation10 + $0x5d4] ss:$24 sps:$4 sm:$0xff]   ;;  %p5620_p8 = scmp.ne.s32.totalorder %s4215_s20, %s5619_s2  ;;  %p5625_p10 = scmp.lt.s32.totalorder %s5619_s2, %s5619_s2 }
  0x9e   :  { %527 = vmatpush1.bf16.msra.mxu0 %v4846_v36  ;;  %649 = vperm.xlu1 %4801, %v237_v48   ;;  %v4909_v36 = vld [vmem:[#allocation10 + $0x364] ss:$24 sps:$4 sm:$0xff]   ;;  %v4924_v48 = vld [vmem:[#allocation10 + $0x2d4] ss:$24 sps:$4 sm:$0xff]  }
  0x9f   :  { %598 = vmatprep.subr.bf16.mxu0 %v4852_v37  ;;  %570 = vmatpush1.bf16.msra.mxu1 %v4849_v39  ;;  %v4907_v37 = vld [vmem:[#allocation10 + $0x360] ss:$24 sps:$4 sm:$0xff]   ;;  %v4915_v39 = vld [vmem:[#allocation10 + $0x334] ss:$24 sps:$4 sm:$0xff]   ;;  %p5626_p11 = por %p5625_p10, %p5624_p9 }
  0xa0   :  { %2649 = vmatprep.subr.bf16.mxu1 %v4876_v45  ;;  %v4916_v45 = vld [vmem:[#allocation10] ss:$24 sps:$4 sm:$0xff]  }
  0xa1   :  { %p5627_p12 = pnand %p5626_p11, %p5620_p8 }
  0xfc   :  { %v175_v51 = vpop.permute.xlu0 %174 }
  0xfd   :  { %vm179_vm1 = vcmp.eq.s32.totalorder %v175_v51, %v172_v52  ;;  %v4922_v51 = vld [vmem:[#allocation10 + $0x2d0] ss:$24 sps:$4 sm:$0xff]  }
 0x100   :  { %v178_v58 = vpop.permute.xlu0 %177 }
 0x101   :  { %vm180_vm2 = vcmp.eq.s32.totalorder %v178_v58, %v172_v52  ;;  %v4925_v52 = vld [vmem:[#allocation10 + $0x5d0] ss:$24 sps:$4 sm:$0xff]   ;;  %v4928_v58 = vld [vmem:[#allocation10 + $0x2a0] ss:$24 sps:$4 sm:$0xff]  }
 0x102   :  { %vm5809_vm3 = vmpackc.low %vm180_vm2, %vm179_vm1 }
 0x103   :  { %4279 = vmatmul.mubr.msk.bf16.vlgmr.msra.gmra.mxu0 %vm5809_vm3, %v5672_v63  ;;  %4281 = vmatmul.mubr.msk.bf16.vlgmr.msra.gmra.mxu1 %vm5809_vm3, %v5672_v63 }
 0x104   :  { %599 = vmatpush1.bf16.msra.mxu0 %v4850_v53  ;;  %v5821_v3 = vpop.permute.xlu0 %644  ;;  %630 = vmatprep.mubr.bf16.mxu0 %v5671_v0 }
 0x105   :  { %600 = vmatprep.subr.bf16.mxu0 %v4855_v56  ;;  %2650 = vmatpush1.bf16.msra.mxu1 %v4874_v57  ;;  %v5826_v6 = vmul.f32 %v5815_v62, %v5821_v3  ;;  %v4930_v56 = vld [vmem:[#allocation10 + $0x2a4] ss:$24 sps:$4 sm:$0xff]  }
 0x106   :  { %2651 = vmatprep.subr.bf16.mxu1 %v4882_v59  ;;  %v4933_v57 = vld [vmem:[#allocation10 + $0x5a4] ss:$24 sps:$4 sm:$0xff]   ;;  %v4931_v59 = vld [vmem:[#allocation10 + $0x5a0] ss:$24 sps:$4 sm:$0xff]  }
 0x108   :  { %601 = vmatpush1.bf16.msra.mxu0 %v4853_v61  ;;  %v4936_v61 = vld [vmem:[#allocation10 + $0x274] ss:$24 sps:$4 sm:$0xff]  }
 0x109   :  { %602 = vmatprep.subr.bf16.mxu0 %v4858_v1  ;;  %2652 = vmatpush1.bf16.msra.mxu1 %v4880_v2  ;;  %v4934_v1 = vld [vmem:[#allocation10 + $0x270] ss:$24 sps:$4 sm:$0xff]  }
 0x10a   :  { %2653 = vmatprep.subr.bf16.mxu1 %v4888_v4  ;;  %v4937_v2 = vld [vmem:[#allocation10 + $0x570] ss:$24 sps:$4 sm:$0xff]   ;;  %v4942_v4 = vld [vmem:[#allocation10 + $0x244] ss:$24 sps:$4 sm:$0xff]  }
 0x10c   :  { %603 = vmatpush1.bf16.msra.mxu0 %v4856_v5  ;;  %v4945_v5 = vld [vmem:[#allocation10 + $0x544] ss:$24 sps:$4 sm:$0xff]  }
 0x10d   :  { %604 = vmatprep.subr.bf16.mxu0 %v4861_v7  ;;  %2654 = vmatpush1.bf16.msra.mxu1 %v4886_v8  ;;  %v4940_v7 = vld [vmem:[#allocation10 + $0x240] ss:$24 sps:$4 sm:$0xff]  }
 0x10e   :  { %2655 = vmatprep.subr.bf16.mxu1 %v4894_v9  ;;  %v4943_v8 = vld [vmem:[#allocation10 + $0x540] ss:$24 sps:$4 sm:$0xff]   ;;  %v4951_v9 = vld [vmem:[#allocation10 + $0x514] ss:$24 sps:$4 sm:$0xff]  }
 0x110   :  { %605 = vmatpush1.bf16.msra.mxu0 %v4859_v10  ;;  %v4946_v10 = vld [vmem:[#allocation10 + $0x210] ss:$24 sps:$4 sm:$0xff]  }
 0x111   :  { %606 = vmatprep.subr.bf16.mxu0 %v4864_v11  ;;  %2656 = vmatpush1.bf16.msra.mxu1 %v4892_v12  ;;  %v4949_v11 = vld [vmem:[#allocation10 + $0x510] ss:$24 sps:$4 sm:$0xff]   ;;  %v4954_v12 = vld [vmem:[#allocation10 + $0x1e4] ss:$24 sps:$4 sm:$0xff]  }
 0x112   :  { %2657 = vmatprep.subr.bf16.mxu1 %v4900_v13  ;;  %v4957_v13 = vld [vmem:[#allocation10 + $0x4e4] ss:$24 sps:$4 sm:$0xff]  }
 0x114   :  { %607 = vmatpush1.bf16.msra.mxu0 %v4862_v14  ;;  %v4952_v14 = vld [vmem:[#allocation10 + $0x1e0] ss:$24 sps:$4 sm:$0xff]  }
 0x115   :  { %608 = vmatprep.subr.bf16.mxu0 %v4867_v15  ;;  %2658 = vmatpush1.bf16.msra.mxu1 %v4898_v16  ;;  %v4955_v15 = vld [vmem:[#allocation10 + $0x4e0] ss:$24 sps:$4 sm:$0xff]   ;;  %v4960_v16 = vld [vmem:[#allocation10 + $0x1b4] ss:$24 sps:$4 sm:$0xff]  }
 0x116   :  { %2659 = vmatprep.subr.bf16.mxu1 %v4906_v17  ;;  %v5830_v47 = vpop.xlane.xlu1 %808  ;;  %v4958_v17 = vld [vmem:[#allocation10 + $0x1b0] ss:$24 sps:$4 sm:$0xff]  }
 0x118   :  { %609 = vmatpush1.bf16.msra.mxu0 %v4865_v18  ;;  %v4961_v18 = vld [vmem:[#allocation10 + $0x4b0] ss:$24 sps:$4 sm:$0xff]  }
 0x119   :  { %610 = vmatprep.subr.bf16.mxu0 %v4870_v19  ;;  %2660 = vmatpush1.bf16.msra.mxu1 %v4904_v20  ;;  %v4963_v19 = vld [vmem:[#allocation10 + $0x4b4] ss:$24 sps:$4 sm:$0xff]   ;;  %v4966_v20 = vld [vmem:[#allocation10 + $0x184] ss:$24 sps:$4 sm:$0xff]  }
 0x11a   :  { %2661 = vmatprep.subr.bf16.mxu1 %v4912_v21  ;;  %v5832_v53 = vpop.permute.xlu1 %649  ;;  %v4969_v21 = vld [vmem:[#allocation10 + $0x484] ss:$24 sps:$4 sm:$0xff]  }
 0x11b   :  { %v5836_v60 = vmul.f32 %v5815_v62, %v5832_v53  ;;  %v4948_v62 = vld [vmem:[#allocation10 + $0x214] ss:$24 sps:$4 sm:$0xff]  }
 0x11c   :  { %611 = vmatpush1.bf16.msra.mxu0 %v4868_v22  ;;  %v4964_v22 = vld [vmem:[#allocation10 + $0x180] ss:$24 sps:$4 sm:$0xff]  }
 0x11d   :  { %612 = vmatprep.subr.bf16.mxu0 %v4873_v23  ;;  %2662 = vmatpush1.bf16.msra.mxu1 %v4910_v24  ;;  %v4967_v23 = vld [vmem:[#allocation10 + $0x480] ss:$24 sps:$4 sm:$0xff]   ;;  %v4972_v24 = vld [vmem:[#allocation10 + $0x754] ss:$24 sps:$4 sm:$0xff]  }
 0x11e   :  { %2663 = vmatprep.subr.bf16.mxu1 %v4918_v42 }
 0x120   :  { %613 = vmatpush1.bf16.msra.mxu0 %v4871_v25  ;;  %v4975_v25 = vld [vmem:[#allocation10 + $0x15c] ss:$24 sps:$4 sm:$0xff]  }
 0x121   :  { %2690 = vmatprep.subr.bf16.mxu0 %v4879_v26  ;;  %2664 = vmatpush1.bf16.msra.mxu1 %v4916_v45  ;;  %v5839_v26 = vsub.s32 2, %v5788_v38 }
 0x122   :  { %2665 = vmatprep.subr.bf16.mxu1 %v4924_v48 }
 0x123   :  { %4283 = vmatmul.mubr.msk.bf16.vlgmr.msra.gmra.mxu0 %vm5809_vm3, %v5672_v63  ;;  %v4939_v63 = vld [vmem:[#allocation10 + $0x574] ss:$24 sps:$4 sm:$0xff]  }
 0x124   :  { %2691 = vmatpush1.bf16.msra.mxu0 %v4877_v27  ;;  %v5842_v27 = vsub.s32 3, %v5788_v38 }
 0x125   :  { %2692 = vmatprep.subr.bf16.mxu0 %v4885_v28  ;;  %2666 = vmatpush2.bf16.msra.mxu1 %v4922_v51  ;;  %v245_v28 = vrot.slane %v5801_v49, %v5795_v44 }
 0x126   :  { %2667 = vmatprep.subr.bf16.mxu1 %v4930_v56 }
 0x128   :  { %2693 = vmatpush1.bf16.msra.mxu0 %v4883_v29  ;;  %v656_v29 = vrot.slane %v5804_v54, %v5795_v44 }
 0x129   :  { %2694 = vmatprep.subr.bf16.mxu0 %v4891_v30  ;;  %2668 = vmatpush2.bf16.msra.mxu1 %v4928_v58  ;;  %v253_v30 = vrot.slane %v5801_v49, %v5839_v26 }
 0x12a   :  { %2669 = vmatprep.subr.bf16.mxu1 %v4936_v61  ;;  %v689_v56 = vmul.f32 %v656_v29, %v5832_v53 }
 0x12c   :  { %2695 = vmatpush1.bf16.msra.mxu0 %v4889_v31  ;;  %v664_v31 = vrot.slane %v5804_v54, %v5839_v26 }
 0x12d   :  { %2696 = vmatprep.subr.bf16.mxu0 %v4897_v32  ;;  %2670 = vmatpush2.bf16.msra.mxu1 %v4934_v1  ;;  %v5852_v32 = vpop.permute.xlu0 %720 }
 0x12e   :  { %2671 = vmatprep.subr.bf16.mxu1 %v4942_v4 }
 0x130   :  { %2697 = vmatpush1.bf16.msra.mxu0 %v4895_v33  ;;  %v660_v33 = vrot.slane %v5804_v54, %v5791_v40 }
 0x131   :  { %2698 = vmatprep.subr.bf16.mxu0 %v4903_v34  ;;  %2672 = vmatpush2.bf16.msra.mxu1 %v4940_v7  ;;  %v668_v34 = vrot.slane %v5804_v54, %v5842_v27  ;;  %v5869_v61 = vpop.permute.xlu0 %713 }
 0x132   :  { %2673 = vmatprep.subr.bf16.mxu1 %v4948_v62 }
 0x134   :  { %2699 = vmatpush1.bf16.msra.mxu0 %v4901_v35  ;;  %v249_v35 = vrot.slane %v5801_v49, %v5791_v40 }
 0x135   :  { %2700 = vmatprep.subr.bf16.mxu0 %v4909_v36  ;;  %2674 = vmatpush2.bf16.msra.mxu1 %v4946_v10  ;;  %v257_v36 = vrot.slane %v5801_v49, %v5842_v27  ;;  %v691_v49 = vmul.f32 %v664_v31, %v5832_v53  ;;  %v690_v10 = vmul.f32 %v660_v33, %v5832_v53 }
 0x136   :  { %2675 = vmatprep.subr.bf16.mxu1 %v4954_v12  ;;  %v692_v12 = vmul.f32 %v668_v34, %v5832_v53 }
 0x138   :  { %2701 = vmatpush1.bf16.msra.mxu0 %v4907_v37  ;;  %v810_v37 = vmax.f32 %v5830_v47, 1.0 }
 0x139   :  { %2702 = vmatprep.subr.bf16.mxu0 %v4915_v39  ;;  %2676 = vmatpush2.bf16.msra.mxu1 %v4952_v14 }
 0x13a   :  { %2677 = vmatprep.subr.bf16.mxu1 %v4960_v16  ;;  %5404 = vrcp.f32 %v810_v37 }
 0x13c   :  { %2703 = vmatpush1.bf16.msra.mxu0 %v4913_v41 }
 0x13d   :  { %2704 = vmatprep.subr.bf16.mxu0 %v4921_v43  ;;  %2678 = vmatpush2.bf16.msra.mxu1 %v4958_v17  ;;  %v683_v43 = vmul.f32 %v656_v29, %v5821_v3 }
 0x13e   :  { %2679 = vmatprep.subr.bf16.mxu1 %v4966_v20 }
 0x140   :  { %2705 = vmatpush1.bf16.msra.mxu0 %v4919_v46  ;;  %v685_v46 = vmul.f32 %v664_v31, %v5821_v3 }
 0x141   :  { %2706 = vmatprep.subr.bf16.mxu0 %v4927_v50  ;;  %2680 = vmatpush2.bf16.msra.mxu1 %v4964_v22  ;;  %v684_v50 = vmul.f32 %v660_v33, %v5821_v3 }
 0x142   :  { %2731 = vmatprep.subr.bf16.mxu1 %v4972_v24 }
 0x144   :  { %2707 = vmatpush2.bf16.msra.mxu0 %v4925_v52  ;;  %v686_v52 = vmul.f32 %v668_v34, %v5821_v3 }
 0x145   :  { %2708 = vmatprep.subr.bf16.mxu0 %v4933_v57 }
 0x148   :  { %2709 = vmatpush2.bf16.msra.mxu0 %v4931_v59 }
 0x149   :  { %2710 = vmatprep.subr.bf16.mxu0 %v4939_v63 }
 0x14c   :  { %2711 = vmatpush2.bf16.msra.mxu0 %v4937_v2 }
 0x14d   :  { %2712 = vmatprep.subr.bf16.mxu0 %v4945_v5 }
 0x150   :  { %2713 = vmatpush2.bf16.msra.mxu0 %v4943_v8 }
 0x151   :  { %2714 = vmatprep.subr.bf16.mxu0 %v4951_v9 }
 0x154   :  { %2715 = vmatpush2.bf16.msra.mxu0 %v4949_v11 }
 0x155   :  { %2716 = vmatprep.subr.bf16.mxu0 %v4957_v13 }
 0x158   :  { %2717 = vmatpush2.bf16.msra.mxu0 %v4955_v15 }
 0x159   :  { %2718 = vmatprep.subr.bf16.mxu0 %v4963_v19 }
 0x15c   :  { %2719 = vmatpush2.bf16.msra.mxu0 %v4961_v18 }
 0x15d   :  { %2720 = vmatprep.subr.bf16.mxu0 %v4969_v21 }
 0x160   :  { %2721 = vmatpush2.bf16.msra.mxu0 %v4967_v23 }
 0x161   :  { %2772 = vmatprep.subr.bf16.mxu0 %v4975_v25 }
 0x1c3   :  { %v546_v39 = vpop.f32.mrf.mxu0  ;;  %v589_v41 = vpop.f32.mrf.mxu1 }
 0x1c4   :  { %v547_v42 = vadd.f32 %v546_v39, %v245_v28  ;;  %v590_v45 = vadd.f32 %v589_v41, %v253_v30 }
 0x1c5   :  { %v548_v48 = vpop.f32.mrf.mxu0  ;;  %v591_v51 = vpop.f32.mrf.mxu1 }
 0x1c6   :  { %v695_v57 = vadd.f32 %v683_v43, %v547_v42  ;;  %v697_v47 = vadd.f32 %v685_v46, %v590_v45  ;;  %v549_v58 = vadd.f32 %v548_v48, %v249_v35  ;;  %v592_v59 = vadd.f32 %v591_v51, %v257_v36 }
 0x1c7   :  { %v550_v63 = vpop.f32.mrf.mxu0  ;;  %v593_v1 = vpop.f32.mrf.mxu1 }
 0x1c8   :  { %v696_v2 = vadd.f32 %v684_v50, %v549_v58  ;;  %v698_v4 = vadd.f32 %v686_v52, %v592_v59  ;;  %v551_v5 = vadd.f32 %v550_v63, %v245_v28  ;;  %v594_v7 = vadd.f32 %v593_v1, %v253_v30 }
 0x1c9   :  { %v722_v8 = vmul.f32 %v5869_v61, %v695_v57  ;;  %v724_v62 = vmul.f32 %v5869_v61, %v697_v47  ;;  %v552_v9 = vpop.f32.mrf.mxu0  ;;  %v595_v11 = vpop.f32.mrf.mxu1 }
 0x1ca   :  { %v701_v13 = vadd.f32 %v689_v56, %v551_v5  ;;  %v703_v14 = vadd.f32 %v691_v49, %v594_v7  ;;  %v723_v15 = vmul.f32 %v5869_v61, %v696_v2  ;;  %v725_v16 = vmul.f32 %v5869_v61, %v698_v4  ;;  %v5881_v2 = vpop.eup %5404 }
 0x1cb   :  { %v734_v17 = vrot.slane %v722_v8, 4  ;;  %v746_v18 = vrot.slane %v724_v62, 4  ;;  %v553_v19 = vadd.f32 %v552_v9, %v249_v35  ;;  %v596_v20 = vadd.f32 %v595_v11, %v257_v36 }
 0x1cc   :  { %v728_v21 = vmul.f32 %v5852_v32, %v701_v13  ;;  %v730_v22 = vmul.f32 %v5852_v32, %v703_v14  ;;  %v740_v23 = vrot.slane %v723_v15, 4  ;;  %v752_v24 = vrot.slane %v725_v16, 4 }
 0x1cd   :  { %v735_v25 = vadd.f32 %v734_v17, %v722_v8  ;;  %v747_v28 = vadd.f32 %v746_v18, %v724_v62  ;;  %v702_v29 = vadd.f32 %v690_v10, %v553_v19  ;;  %v704_v30 = vadd.f32 %v692_v12, %v596_v20 }
 0x1ce   :  { %v770_v31 = vrot.slane %v728_v21, 4  ;;  %v782_v33 = vrot.slane %v730_v22, 4  ;;  %v741_v34 = vadd.f32 %v740_v23, %v723_v15  ;;  %v753_v37 = vadd.f32 %v752_v24, %v725_v16 }
 0x1cf   :  { %v736_v39 = vrot.slane %v735_v25, 2  ;;  %v748_v41 = vrot.slane %v747_v28, 2  ;;  %v729_v42 = vmul.f32 %v5852_v32, %v702_v29  ;;  %v731_v35 = vmul.f32 %v5852_v32, %v704_v30 }
 0x1d0   :  { %v771_v36 = vadd.f32 %v770_v31, %v728_v21  ;;  %v783_v43 = vadd.f32 %v782_v33, %v730_v22  ;;  %v742_v45 = vrot.slane %v741_v34, 2  ;;  %v754_v46 = vrot.slane %v753_v37, 2 }
 0x1d1   :  { %v737_v48 = vadd.f32 %v736_v39, %v735_v25  ;;  %v749_v50 = vadd.f32 %v748_v41, %v747_v28  ;;  %v776_v51 = vrot.slane %v729_v42, 4  ;;  %v788_v52 = vrot.slane %v731_v35, 4 }
 0x1d2   :  { %v772_v56 = vrot.slane %v771_v36, 2  ;;  %v784_v49 = vrot.slane %v783_v43, 2  ;;  %v743_v57 = vadd.f32 %v742_v45, %v741_v34  ;;  %v755_v47 = vadd.f32 %v754_v46, %v753_v37 }
 0x1d3   :  { %v738_v58 = vrot.slane %v737_v48, 1  ;;  %v750_v59 = vrot.slane %v749_v50, 1  ;;  %v777_v63 = vadd.f32 %v776_v51, %v729_v42  ;;  %v789_v1 = vadd.f32 %v788_v52, %v731_v35  ;;  %v5418_v52 = vld [vmem:[#allocation7] ss:$2 sm:$0x3f] }
 0x1d4   :  { %v773_v4 = vadd.f32 %v772_v56, %v771_v36  ;;  %v785_v5 = vadd.f32 %v784_v49, %v783_v43  ;;  %v744_v7 = vrot.slane %v743_v57, 1  ;;  %v756_v8 = vrot.slane %v755_v47, 1 }
 0x1d5   :  { %v778_v62 = vrot.slane %v777_v63, 2  ;;  %v790_v9 = vrot.slane %v789_v1, 2  ;;  %v739_v12 = vadd.f32 %v738_v58, %v737_v48  ;;  %v751_v13 = vadd.f32 %v750_v59, %v749_v50 }
 0x1d6   :  { %v774_v10 = vrot.slane %v773_v4, 1  ;;  %v786_v11 = vrot.slane %v785_v5, 1  ;;  %v745_v16 = vadd.f32 %v744_v7, %v743_v57  ;;  %v757_v17 = vadd.f32 %v756_v8, %v755_v47 }
 0x1d7   :  { %v779_v14 = vadd.f32 %v778_v62, %v777_v63  ;;  %v791_v15 = vadd.f32 %v790_v9, %v789_v1  ;;  %v5884_v19 = vrot.slane %v5881_v2, 1  ;;  %v816_v25 = vmul.f32 %v5881_v2, %v739_v12 }
 0x1d8   :  { %v775_v18 = vadd.f32 %v774_v10, %v773_v4  ;;  %v787_v20 = vadd.f32 %v786_v11, %v785_v5  ;;  %v818_v28 = vmul.f32 %v5881_v2, %v751_v13  ;;  %v817_v31 = vmul.f32 %v5881_v2, %v745_v16 }
 0x1d9   :  { %v780_v21 = vrot.slane %v779_v14, 1  ;;  %v792_v22 = vrot.slane %v791_v15, 1  ;;  %v819_v33 = vmul.f32 %v5881_v2, %v757_v17  ;;  %v5893_v39 = vsub.s32 5, %v5788_v38 }
 0x1da   :  { %v822_v23 = vmul.f32 %v5884_v19, %v775_v18  ;;  %v824_v24 = vmul.f32 %v5884_v19, %v787_v20  ;;  %v828_v35 = vpack.c.bf16 %v816_v25, %v816_v25  ;;  %v830_v43 = vpack.c.bf16 %v818_v28, %v818_v28  ;;  %v4970_v20 = vld [vmem:[#allocation10 + $0x750] ss:$24 sps:$4 sm:$0xff]   ;;  %v4978_v25 = vld [vmem:[#allocation10 + $0x724] ss:$24 sps:$4 sm:$0xff]  }
 0x1db   :  { %v781_v29 = vadd.f32 %v780_v21, %v779_v14  ;;  %v793_v30 = vadd.f32 %v792_v22, %v791_v15  ;;  %v829_v46 = vpack.c.bf16 %v817_v31, %v817_v31  ;;  %v831_v50 = vpack.c.bf16 %v819_v33, %v819_v33  ;;  %v4973_v21 = vld [vmem:[#allocation10 + $0x158] ss:$24 sps:$4 sm:$0xff]  }
 0x1dc   :  { %v834_v34 = vpack.c.bf16 %v822_v23, %v822_v23  ;;  %v836_v37 = vpack.c.bf16 %v824_v24, %v824_v24  ;;  %v261_v56 = vrot.slane %v5418_v52, %v5807_v55  ;;  %v676_v38 = vrot.slane %v5804_v54, %v5893_v39 }
 0x1dd   :  { %v823_v41 = vmul.f32 %v5884_v19, %v781_v29  ;;  %v825_v42 = vmul.f32 %v5884_v19, %v793_v30  ;;  %v265_v59 = vrot.slane %v5418_v52, %v5893_v39  ;;  %v1172_v63 = vunpack.c.l.b16 %v828_v35  ;;  %v4979_v35 = vld [vmem:[#allocation10 + $0x128] ss:$24 sps:$4 sm:$0xff]  }
 0x1de   :  { %v1178_v36 = vunpack.c.l.b16 %v834_v34  ;;  %v1180_v45 = vunpack.c.l.b16 %v836_v37  ;;  %v1174_v1 = vunpack.c.l.b16 %v830_v43  ;;  %v1173_v5 = vunpack.c.l.b16 %v829_v46  ;;  %v4987_v43 = vld [vmem:[#allocation10 + $0xfc] ss:$24 sps:$4 sm:$0xff]   ;;  %v4982_v52 = vld [vmem:[#allocation10 + $0x6f0] ss:$24 sps:$4 sm:$0xff]  }
 0x1df   :  { %v835_v48 = vpack.c.bf16 %v823_v41, %v823_v41  ;;  %v837_v51 = vpack.c.bf16 %v825_v42, %v825_v42  ;;  %v1175_v8 = vunpack.c.l.b16 %v831_v50  ;;  %v688_v54 = vmul.f32 %v676_v38, %v5821_v3  ;;  %v4976_v42 = vld [vmem:[#allocation10 + $0x720] ss:$24 sps:$4 sm:$0xff]  }
 0x1e0   :  { %v1184_v49 = vrot.slane %v1178_v36, 7  ;;  %v1189_v57 = vrot.slane %v1180_v45, 7  ;;  %v694_v31 = vmul.f32 %v676_v38, %v5832_v53  ;;  %v4984_v36 = vld [vmem:[#allocation10 + $0x6f4] ss:$24 sps:$4 sm:$0xff]  }
 0x1e1   :  { %v1179_v47 = vunpack.c.l.b16 %v835_v48  ;;  %v1181_v58 = vunpack.c.l.b16 %v837_v51 }
 0x1e2   :  { %v1186_v10 = vsel %vm1185_vm4, %v1184_v49, %v1172_v63  ;;  %v1190_v11 = vsel %vm1185_vm4, %v1189_v57, %v1174_v1  ;;  %v4990_v49 = vld [vmem:[#allocation10 + $0x6c4] ss:$24 sps:$4 sm:$0xff]  }
 0x1e3   :  { %v632_v4 = vpop.f32.mrf.mxu0  ;;  %v1187_v7 = vrot.slane %v1179_v47, 7  ;;  %v1191_v62 = vrot.slane %v1181_v58, 7  ;;  %v5911_v23 = vpack.c.b16 %v1186_v10, %v1186_v10  ;;  %v5913_v24 = vpack.c.b16 %v1190_v11, %v1190_v11  ;;  %v4993_v57 = vld [vmem:[#allocation10 + $0xcc] ss:$24 sps:$4 sm:$0xff]  }
 0x1e4   :  { %v633_v9 = vadd.f32 %v632_v4, %v261_v56 }
 0x1e5   :  { %v634_v12 = vpop.f32.mrf.mxu0  ;;  %v1188_v13 = vsel %vm1185_vm4, %v1187_v7, %v1173_v5  ;;  %v1192_v14 = vsel %vm1185_vm4, %v1191_v62, %v1175_v8  ;;  %v4988_v7 = vld [vmem:[#allocation10 + $0x6c0] ss:$24 sps:$4 sm:$0xff]   ;;  %v4996_v8 = vld [vmem:[#allocation10 + $0x694] ss:$24 sps:$4 sm:$0xff]  }
 0x1e6   :  { %v699_v15 = vadd.f32 %v5826_v6, %v633_v9  ;;  %v635_v16 = vadd.f32 %v634_v12, %v265_v59  ;;  %v5907_v17 = vpack.c.b16 %v1188_v13, %v1188_v13  ;;  %v5909_v18 = vpack.c.b16 %v1192_v14, %v1192_v14  ;;  %v4981_v6 = vld [vmem:[#allocation10 + $0x12c] ss:$24 sps:$4 sm:$0xff]   ;;  %v4999_v62 = vld [vmem:[#allocation10 + $0x9c] ss:$24 sps:$4 sm:$0xff]  }
 0x1e7   :  { %v636_v22 = vpop.f32.mrf.mxu0 }
 0x1e8   :  { %v726_v3 = vmul.f32 %v5869_v61, %v699_v15  ;;  %v700_v28 = vadd.f32 %v688_v54, %v635_v16  ;;  %v637_v29 = vadd.f32 %v636_v22, %v261_v56  ;;  %2681 = vmatprep.mubr.bf16.mxu1 %v5907_v17  ;;  %2722 = vmatprep.mubr.bf16.mxu0 %v5909_v18  ;;  %v4985_v56 = vld [vmem:[#allocation10 + $0xf8] ss:$24 sps:$4 sm:$0xff]  }
 0x1e9   :  { %v638_v30 = vpop.f32.mrf.mxu0  ;;  %2682 = vmatmul.mubr.bf16.vlgmr.msra.gmra.mxu1 %v5911_v23  ;;  %2723 = vmatmul.mubr.bf16.vlgmr.msra.gmra.mxu0 %v5913_v24  ;;  %v4994_v15 = vld [vmem:[#allocation10 + $0x690] ss:$24 sps:$4 sm:$0xff]  }
 0x1ea   :  { %v758_v33 = vrot.slane %v726_v3, 4  ;;  %v727_v34 = vmul.f32 %v5869_v61, %v700_v28  ;;  %v705_v37 = vadd.f32 %v5836_v60, %v637_v29  ;;  %v639_v41 = vadd.f32 %v638_v30, %v265_v59  ;;  %2732 = vmatpush1.bf16.msra.mxu1 %v4970_v20  ;;  %2773 = vmatpush1.bf16.msra.mxu0 %v4973_v21  ;;  %v4997_v16 = vld [vmem:[#allocation10 + $0x98] ss:$24 sps:$4 sm:$0xff]   ;;  %v5002_v20 = vld [vmem:[#allocation10 + $0x664] ss:$24 sps:$4 sm:$0xff]  }
 0x1eb   :  { %2804 = vmatprep.mubr.bf16.mxu0 %v5907_v17  ;;  %2733 = vmatprep.subr.bf16.mxu1 %v4978_v25  ;;  %v5005_v21 = vld [vmem:[#allocation10 + $0x6c] ss:$24 sps:$4 sm:$0xff]   ;;  %v5003_v30 = vld [vmem:[#allocation10 + $0x68] ss:$24 sps:$4 sm:$0xff]  }
 0x1ec   :  { %v759_v53 = vadd.f32 %v758_v33, %v726_v3  ;;  %v764_v45 = vrot.slane %v727_v34, 4  ;;  %v732_v46 = vmul.f32 %v5852_v32, %v705_v37  ;;  %v706_v48 = vadd.f32 %v694_v31, %v639_v41  ;;  %2774 = vmatprep.subr.bf16.mxu0 %v4981_v6  ;;  %v5000_v6 = vld [vmem:[#allocation10 + $0x660] ss:$24 sps:$4 sm:$0xff]   ;;  %v5008_v33 = vld [vmem:[#allocation10 + $0x634] ss:$24 sps:$4 sm:$0xff]  }
 0x1ee   :  { %v760_v50 = vrot.slane %v759_v53, 2  ;;  %v765_v61 = vadd.f32 %v764_v45, %v727_v34  ;;  %v794_v51 = vrot.slane %v732_v46, 4  ;;  %v733_v60 = vmul.f32 %v5852_v32, %v706_v48  ;;  %2734 = vmatpush1.bf16.msra.mxu1 %v4976_v42  ;;  %2775 = vmatpush1.bf16.msra.mxu0 %v4979_v35  ;;  %v4991_v32 = vld [vmem:[#allocation10 + $0xc8] ss:$24 sps:$4 sm:$0xff]   ;;  %v5011_v34 = vld [vmem:[#allocation10 + $0x3c] ss:$24 sps:$4 sm:$0xff]  }
 0x1ef   :  { %2735 = vmatprep.subr.bf16.mxu1 %v4984_v36  ;;  %2776 = vmatprep.subr.bf16.mxu0 %v4987_v43  ;;  %v5006_v35 = vld [vmem:[#allocation10 + $0x630] ss:$24 sps:$4 sm:$0xff]   ;;  %v5017_v48 = vld [vmem:[#allocation10 + $0xc] ss:$24 sps:$4 sm:$0xff]  }
 0x1f0   :  { %v761_v38 = vadd.f32 %v760_v50, %v759_v53  ;;  %v766_v47 = vrot.slane %v765_v61, 2  ;;  %v795_v58 = vadd.f32 %v794_v51, %v732_v46  ;;  %v800_v59 = vrot.slane %v733_v60, 4  ;;  %v5009_v36 = vld [vmem:[#allocation10 + $0x38] ss:$24 sps:$4 sm:$0xff]   ;;  %v5014_v46 = vld [vmem:[#allocation10 + $0x604] ss:$24 sps:$4 sm:$0xff]  }
 0x1f1   :  { %v5012_v51 = vld [vmem:[#allocation10 + $0x600] ss:$24 sps:$4 sm:$0xff]  }
 0x1f2   :  { %v762_v63 = vrot.slane %v761_v38, 1  ;;  %v767_v1 = vadd.f32 %v766_v47, %v765_v61  ;;  %v796_v4 = vrot.slane %v795_v58, 2  ;;  %v801_v5 = vadd.f32 %v800_v59, %v733_v60  ;;  %2736 = vmatpush1.bf16.msra.mxu1 %v4982_v52  ;;  %2777 = vmatpush1.bf16.msra.mxu0 %v4985_v56  ;;  %v5015_v60 = vld [vmem:[#allocation10 + $0x8] ss:$24 sps:$4 sm:$0xff]   ;;  %v5021_v59 = vld [vmem:[#allocation10 + $0x2d8] ss:$24 sps:$4 sm:$0xff]  }
 0x1f3   :  { %2737 = vmatprep.subr.bf16.mxu1 %v4990_v49  ;;  %2778 = vmatprep.subr.bf16.mxu0 %v4993_v57  ;;  %v5020_v49 = vld [vmem:[#allocation10 + $0x8d4] ss:$24 sps:$4 sm:$0xff]  }
 0x1f4   :  { %v763_v9 = vadd.f32 %v762_v63, %v761_v38  ;;  %v768_v10 = vrot.slane %v767_v1, 1  ;;  %v797_v11 = vadd.f32 %v796_v4, %v795_v58  ;;  %v802_v12 = vrot.slane %v801_v5, 2  ;;  %v5023_v38 = vld [vmem:[#allocation10 + $0x2dc] ss:$24 sps:$4 sm:$0xff]   ;;  %v5018_v58 = vld [vmem:[#allocation10 + $0x8d0] ss:$24 sps:$4 sm:$0xff]  }
 0x1f5   :  { %v5026_v63 = vld [vmem:[#allocation10 + $0x8a4] ss:$24 sps:$4 sm:$0xff]   ;;  %v5024_v4 = vld [vmem:[#allocation10 + $0x8a0] ss:$24 sps:$4 sm:$0xff]  }
 0x1f6   :  { %v769_v54 = vadd.f32 %v768_v10, %v767_v1  ;;  %v798_v13 = vrot.slane %v797_v11, 1  ;;  %v803_v14 = vadd.f32 %v802_v12, %v801_v5  ;;  %2738 = vmatpush1.bf16.msra.mxu1 %v4988_v7  ;;  %2779 = vmatpush1.bf16.msra.mxu0 %v4991_v32  ;;  %v820_v22 = vmul.f32 %v5881_v2, %v763_v9  ;;  %v5029_v1 = vld [vmem:[#allocation10 + $0x2ac] ss:$24 sps:$4 sm:$0xff]   ;;  %v5027_v5 = vld [vmem:[#allocation10 + $0x2a8] ss:$24 sps:$4 sm:$0xff]  }
 0x1f7   :  { %2739 = vmatprep.subr.bf16.mxu1 %v4996_v8  ;;  %2780 = vmatprep.subr.bf16.mxu0 %v4999_v62  ;;  %v5032_v7 = vld [vmem:[#allocation10 + $0x874] ss:$24 sps:$4 sm:$0xff]   ;;  %v5030_v8 = vld [vmem:[#allocation10 + $0x870] ss:$24 sps:$4 sm:$0xff]   ;;  %v5038_v9 = vld [vmem:[#allocation10 + $0x844] ss:$24 sps:$4 sm:$0xff]  }
 0x1f8   :  { %v799_v25 = vadd.f32 %v798_v13, %v797_v11  ;;  %v804_v3 = vrot.slane %v803_v14, 1  ;;  %v821_v31 = vmul.f32 %v5881_v2, %v769_v54  ;;  %v832_v42 = vpack.c.bf16 %v820_v22, %v820_v22  ;;  %v5035_v32 = vld [vmem:[#allocation10 + $0x27c] ss:$24 sps:$4 sm:$0xff]   ;;  %v5033_v62 = vld [vmem:[#allocation10 + $0x278] ss:$24 sps:$4 sm:$0xff]  }
 0x1f9   :  { %v5041_v10 = vld [vmem:[#allocation10 + $0x24c] ss:$24 sps:$4 sm:$0xff]   ;;  %v5036_v11 = vld [vmem:[#allocation10 + $0x840] ss:$24 sps:$4 sm:$0xff]   ;;  %v5047_v13 = vld [vmem:[#allocation10 + $0x21c] ss:$24 sps:$4 sm:$0xff]  }
 0x1fa   :  { %v826_v28 = vmul.f32 %v5884_v19, %v799_v25  ;;  %v805_v29 = vadd.f32 %v804_v3, %v803_v14  ;;  %2740 = vmatpush1.bf16.msra.mxu1 %v4994_v15  ;;  %2781 = vmatpush1.bf16.msra.mxu0 %v4997_v16  ;;  %v833_v43 = vpack.c.bf16 %v821_v31, %v821_v31  ;;  %v1176_v50 = vunpack.c.l.b16 %v832_v42  ;;  %v5039_v12 = vld [vmem:[#allocation10 + $0x248] ss:$24 sps:$4 sm:$0xff]   ;;  %v5044_v54 = vld [vmem:[#allocation10 + $0x814] ss:$24 sps:$4 sm:$0xff]   ;;  %v5045_v15 = vld [vmem:[#allocation10 + $0x218] ss:$24 sps:$4 sm:$0xff]  }
 0x1fb   :  { %2741 = vmatprep.subr.bf16.mxu1 %v5002_v20  ;;  %2782 = vmatprep.subr.bf16.mxu0 %v5005_v21  ;;  %v5042_v14 = vld [vmem:[#allocation10 + $0x810] ss:$24 sps:$4 sm:$0xff]   ;;  %v5050_v16 = vld [vmem:[#allocation10 + $0x7e4] ss:$24 sps:$4 sm:$0xff]   ;;  %v5048_v21 = vld [vmem:[#allocation10 + $0x7e0] ss:$24 sps:$4 sm:$0xff]  }
 0x1fc   :  { %v838_v37 = vpack.c.bf16 %v826_v28, %v826_v28  ;;  %v827_v41 = vmul.f32 %v5884_v19, %v805_v29  ;;  %v1177_v19 = vunpack.c.l.b16 %v833_v43  ;;  %v5053_v20 = vld [vmem:[#allocation10 + $0x1ec] ss:$24 sps:$4 sm:$0xff]   ;;  %v5051_v22 = vld [vmem:[#allocation10 + $0x1e8] ss:$24 sps:$4 sm:$0xff]   ;;  %v5059_v3 = vld [vmem:[#allocation10 + $0x1bc] ss:$24 sps:$4 sm:$0xff]  }
 0x1fd   :  { %v5056_v25 = vld [vmem:[#allocation10 + $0x7b4] ss:$24 sps:$4 sm:$0xff]   ;;  %v5054_v28 = vld [vmem:[#allocation10 + $0x7b0] ss:$24 sps:$4 sm:$0xff]   ;;  %v5060_v31 = vld [vmem:[#allocation10 + $0x780] ss:$24 sps:$4 sm:$0xff]  }
 0x1fe   :  { %2742 = vmatpush1.bf16.msra.mxu1 %v5000_v6  ;;  %2783 = vmatpush1.bf16.msra.mxu0 %v5003_v30  ;;  %v839_v53 = vpack.c.bf16 %v827_v41, %v827_v41  ;;  %v1182_v45 = vunpack.c.l.b16 %v838_v37  ;;  %v5057_v29 = vld [vmem:[#allocation10 + $0x1b8] ss:$24 sps:$4 sm:$0xff]   ;;  %v5062_v6 = vld [vmem:[#allocation10 + $0x784] ss:$24 sps:$4 sm:$0xff]  }
 0x1ff   :  { %2743 = vmatprep.subr.bf16.mxu1 %v5008_v33  ;;  %2784 = vmatprep.subr.bf16.mxu0 %v5011_v34  ;;  %v5065_v30 = vld [vmem:[#allocation10 + $0x18c] ss:$24 sps:$4 sm:$0xff]   ;;  %v5063_v33 = vld [vmem:[#allocation10 + $0x188] ss:$24 sps:$4 sm:$0xff]   ;;  %v5068_v34 = vld [vmem:[#allocation10 + $0x45c] ss:$24 sps:$4 sm:$0xff]  }
 0x200   :  { %v1183_v2 = vunpack.c.l.b16 %v839_v53  ;;  %v1193_v61 = vrot.slane %v1182_v45, 7  ;;  %v5071_v37 = vld [vmem:[#allocation10 + $0x75c] ss:$24 sps:$4 sm:$0xff]   ;;  %v5066_v41 = vld [vmem:[#allocation10 + $0x458] ss:$24 sps:$4 sm:$0xff]  }
 0x201   :  { %v5077_v43 = vld [vmem:[#allocation10 + $0x72c] ss:$24 sps:$4 sm:$0xff]   ;;  %v5072_v53 = vld [vmem:[#allocation10 + $0x428] ss:$24 sps:$4 sm:$0xff]  }
 0x202   :  { %2744 = vmatpush1.bf16.msra.mxu1 %v5006_v35  ;;  %2785 = vmatpush1.bf16.msra.mxu0 %v5009_v36  ;;  %v1195_v52 = vrot.slane %v1183_v2, 7  ;;  %v5931_v56 = vsel %vm1185_vm4, %v1193_v61, %v1176_v50  ;;  %v5069_v35 = vld [vmem:[#allocation10 + $0x758] ss:$24 sps:$4 sm:$0xff]   ;;  %v5074_v36 = vld [vmem:[#allocation10 + $0x42c] ss:$24 sps:$4 sm:$0xff]  }
 0x203   :  { %2745 = vmatprep.subr.bf16.mxu1 %v5014_v46  ;;  %2786 = vmatprep.subr.bf16.mxu0 %v5017_v48  ;;  %v5939_v42 = vpack.c.b16 %v5931_v56, %v5931_v56  ;;  %v5075_v45 = vld [vmem:[#allocation10 + $0x728] ss:$24 sps:$4 sm:$0xff]   ;;  %v5080_v46 = vld [vmem:[#allocation10 + $0x3fc] ss:$24 sps:$4 sm:$0xff]   ;;  %v5078_v2 = vld [vmem:[#allocation10 + $0x3f8] ss:$24 sps:$4 sm:$0xff]  }
 0x204   :  { %v1196_v57 = vsel %vm1185_vm4, %v1195_v52, %v1177_v19  ;;  %v5083_v48 = vld [vmem:[#allocation10 + $0x6fc] ss:$24 sps:$4 sm:$0xff]   ;;  %v5081_v50 = vld [vmem:[#allocation10 + $0x6f8] ss:$24 sps:$4 sm:$0xff]   ;;  %v5086_v61 = vld [vmem:[#allocation10 + $0x3cc] ss:$24 sps:$4 sm:$0xff]  }
 0x205   :  { %v5934_v47 = vpack.c.b16 %v1196_v57, %v1196_v57  ;;  %v5087_v19 = vld [vmem:[#allocation10 + $0x6c8] ss:$24 sps:$4 sm:$0xff]   ;;  %v5092_v52 = vld [vmem:[#allocation10 + $0x39c] ss:$24 sps:$4 sm:$0xff]   ;;  %v5093_v57 = vld [vmem:[#allocation10 + $0x698] ss:$24 sps:$4 sm:$0xff]  }
 0x206   :  { %2746 = vmatpush1.bf16.msra.mxu1 %v5012_v51  ;;  %2787 = vmatpush1.bf16.msra.mxu0 %v5015_v60  ;;  %v5089_v51 = vld [vmem:[#allocation10 + $0x6cc] ss:$24 sps:$4 sm:$0xff]   ;;  %v5084_v60 = vld [vmem:[#allocation10 + $0x3c8] ss:$24 sps:$4 sm:$0xff]   ;;  %v5095_v56 = vld [vmem:[#allocation10 + $0x69c] ss:$24 sps:$4 sm:$0xff]  }
 0x207   :  { %2763 = vmatprep.mubr.bf16.mxu1 %v5934_v47  ;;  %2747 = vmatprep.subr.bf16.mxu1 %v5020_v49  ;;  %v5090_v49 = vld [vmem:[#allocation10 + $0x398] ss:$24 sps:$4 sm:$0xff]  }
 0x208   :  { %2788 = vmatprep.subr.bf16.mxu0 %v5023_v38  ;;  %v5098_v38 = vld [vmem:[#allocation10 + $0x36c] ss:$24 sps:$4 sm:$0xff]  }
 0x20a   :  { %2748 = vmatpush2.bf16.msra.mxu1 %v5018_v58  ;;  %2789 = vmatpush2.bf16.msra.mxu0 %v5021_v59  ;;  %v5101_v58 = vld [vmem:[#allocation10 + $0x66c] ss:$24 sps:$4 sm:$0xff]   ;;  %v5096_v59 = vld [vmem:[#allocation10 + $0x368] ss:$24 sps:$4 sm:$0xff]  }
 0x20b   :  { %2749 = vmatprep.subr.bf16.mxu1 %v5026_v63  ;;  %2790 = vmatprep.subr.bf16.mxu0 %v5029_v1  ;;  %v5099_v63 = vld [vmem:[#allocation10 + $0x668] ss:$24 sps:$4 sm:$0xff]   ;;  %v5104_v1 = vld [vmem:[#allocation10 + $0x33c] ss:$24 sps:$4 sm:$0xff]  }
 0x20e   :  { %2750 = vmatpush2.bf16.msra.mxu1 %v5024_v4  ;;  %2791 = vmatpush2.bf16.msra.mxu0 %v5027_v5  ;;  %v5107_v4 = vld [vmem:[#allocation10 + $0x63c] ss:$24 sps:$4 sm:$0xff]   ;;  %v5102_v5 = vld [vmem:[#allocation10 + $0x338] ss:$24 sps:$4 sm:$0xff]  }
 0x20f   :  { %2751 = vmatprep.subr.bf16.mxu1 %v5032_v7  ;;  %2792 = vmatprep.subr.bf16.mxu0 %v5035_v32  ;;  %v5105_v7 = vld [vmem:[#allocation10 + $0x638] ss:$24 sps:$4 sm:$0xff]   ;;  %v5110_v32 = vld [vmem:[#allocation10 + $0x30c] ss:$24 sps:$4 sm:$0xff]  }
 0x212   :  { %2752 = vmatpush2.bf16.msra.mxu1 %v5030_v8  ;;  %2793 = vmatpush2.bf16.msra.mxu0 %v5033_v62  ;;  %v5113_v8 = vld [vmem:[#allocation10 + $0x60c] ss:$24 sps:$4 sm:$0xff]   ;;  %v5108_v62 = vld [vmem:[#allocation10 + $0x308] ss:$24 sps:$4 sm:$0xff]  }
 0x213   :  { %2753 = vmatprep.subr.bf16.mxu1 %v5038_v9  ;;  %2794 = vmatprep.subr.bf16.mxu0 %v5041_v10  ;;  %v5111_v9 = vld [vmem:[#allocation10 + $0x608] ss:$24 sps:$4 sm:$0xff]   ;;  %v5116_v10 = vld [vmem:[#allocation10 + $0x5dc] ss:$24 sps:$4 sm:$0xff]  }
 0x216   :  { %2754 = vmatpush2.bf16.msra.mxu1 %v5036_v11  ;;  %2795 = vmatpush2.bf16.msra.mxu0 %v5039_v12  ;;  %v5119_v11 = vld [vmem:[#allocation10 + $0x8dc] ss:$24 sps:$4 sm:$0xff]   ;;  %v5114_v12 = vld [vmem:[#allocation10 + $0x5d8] ss:$24 sps:$4 sm:$0xff]  }
 0x217   :  { %2755 = vmatprep.subr.bf16.mxu1 %v5044_v54  ;;  %2796 = vmatprep.subr.bf16.mxu0 %v5047_v13  ;;  %v5117_v54 = vld [vmem:[#allocation10 + $0x8d8] ss:$24 sps:$4 sm:$0xff]   ;;  %v5122_v13 = vld [vmem:[#allocation10 + $0x5ac] ss:$24 sps:$4 sm:$0xff]  }
 0x21a   :  { %2756 = vmatpush2.bf16.msra.mxu1 %v5042_v14  ;;  %2797 = vmatpush2.bf16.msra.mxu0 %v5045_v15  ;;  %v5125_v14 = vld [vmem:[#allocation10 + $0x8ac] ss:$24 sps:$4 sm:$0xff]   ;;  %v5120_v15 = vld [vmem:[#allocation10 + $0x5a8] ss:$24 sps:$4 sm:$0xff]  }
 0x21b   :  { %2757 = vmatprep.subr.bf16.mxu1 %v5050_v16  ;;  %2798 = vmatprep.subr.bf16.mxu0 %v5053_v20  ;;  %v5123_v16 = vld [vmem:[#allocation10 + $0x8a8] ss:$24 sps:$4 sm:$0xff]   ;;  %v5128_v20 = vld [vmem:[#allocation10 + $0x57c] ss:$24 sps:$4 sm:$0xff]  }
 0x21e   :  { %2758 = vmatpush2.bf16.msra.mxu1 %v5048_v21  ;;  %2799 = vmatpush2.bf16.msra.mxu0 %v5051_v22  ;;  %v5131_v21 = vld [vmem:[#allocation10 + $0x87c] ss:$24 sps:$4 sm:$0xff]   ;;  %v5126_v22 = vld [vmem:[#allocation10 + $0x578] ss:$24 sps:$4 sm:$0xff]  }
 0x21f   :  { %2759 = vmatprep.subr.bf16.mxu1 %v5056_v25  ;;  %2800 = vmatprep.subr.bf16.mxu0 %v5059_v3  ;;  %v5129_v25 = vld [vmem:[#allocation10 + $0x878] ss:$24 sps:$4 sm:$0xff]   ;;  %v5134_v3 = vld [vmem:[#allocation10 + $0x54c] ss:$24 sps:$4 sm:$0xff]  }
 0x222   :  { %2760 = vmatpush2.bf16.msra.mxu1 %v5054_v28  ;;  %2801 = vmatpush2.bf16.msra.mxu0 %v5057_v29  ;;  %v5137_v28 = vld [vmem:[#allocation10 + $0x84c] ss:$24 sps:$4 sm:$0xff]   ;;  %v5132_v29 = vld [vmem:[#allocation10 + $0x548] ss:$24 sps:$4 sm:$0xff]  }
 0x223   :  { %2761 = vmatprep.subr.bf16.mxu1 %v5062_v6  ;;  %2802 = vmatprep.subr.bf16.mxu0 %v5065_v30  ;;  %v5135_v6 = vld [vmem:[#allocation10 + $0x848] ss:$24 sps:$4 sm:$0xff]   ;;  %v5140_v30 = vld [vmem:[#allocation10 + $0x51c] ss:$24 sps:$4 sm:$0xff]  }
 0x226   :  { %2762 = vmatpush2.bf16.msra.mxu1 %v5060_v31  ;;  %2803 = vmatpush2.bf16.msra.mxu0 %v5063_v33  ;;  %v5143_v31 = vld [vmem:[#allocation10 + $0x81c] ss:$24 sps:$4 sm:$0xff]   ;;  %v5138_v33 = vld [vmem:[#allocation10 + $0x518] ss:$24 sps:$4 sm:$0xff]  }
 0x227   :  { %2813 = vmatprep.subr.bf16.mxu1 %v5068_v34  ;;  %2854 = vmatprep.subr.bf16.mxu0 %v5071_v37  ;;  %v5141_v34 = vld [vmem:[#allocation10 + $0x818] ss:$24 sps:$4 sm:$0xff]   ;;  %v5146_v37 = vld [vmem:[#allocation10 + $0x4ec] ss:$24 sps:$4 sm:$0xff]  }
 0x229   :  { %2764 = vmatmul.mubr.bf16.vlgmr.msra.gmra.mxu1 %v5939_v42  ;;  %2805 = vmatmul.mubr.bf16.vlgmr.msra.gmra.mxu0 %v5911_v23 }
 0x22a   :  { %2814 = vmatpush1.bf16.msra.mxu1 %v5066_v41  ;;  %2845 = vmatprep.mubr.bf16.mxu1 %v5909_v18  ;;  %v5149_v41 = vld [vmem:[#allocation10 + $0x7ec] ss:$24 sps:$4 sm:$0xff]  }
 0x22b   :  { %2855 = vmatpush1.bf16.msra.mxu0 %v5069_v35  ;;  %2886 = vmatprep.mubr.bf16.mxu0 %v5934_v47  ;;  %v5144_v35 = vld [vmem:[#allocation10 + $0x4e8] ss:$24 sps:$4 sm:$0xff]  }
 0x22c   :  { %2815 = vmatprep.subr.bf16.mxu1 %v5074_v36  ;;  %2856 = vmatprep.subr.bf16.mxu0 %v5077_v43  ;;  %v5147_v36 = vld [vmem:[#allocation10 + $0x7e8] ss:$24 sps:$4 sm:$0xff]   ;;  %v5152_v43 = vld [vmem:[#allocation10 + $0x4bc] ss:$24 sps:$4 sm:$0xff]  }
 0x22e   :  { %2816 = vmatpush1.bf16.msra.mxu1 %v5072_v53  ;;  %v5155_v53 = vld [vmem:[#allocation10 + $0x7bc] ss:$24 sps:$4 sm:$0xff]  }
 0x22f   :  { %2857 = vmatpush1.bf16.msra.mxu0 %v5075_v45  ;;  %2817 = vmatprep.subr.bf16.mxu1 %v5080_v46  ;;  %v5150_v45 = vld [vmem:[#allocation10 + $0x4b8] ss:$24 sps:$4 sm:$0xff]  }
 0x230   :  { %2858 = vmatprep.subr.bf16.mxu0 %v5083_v48  ;;  %v5153_v46 = vld [vmem:[#allocation10 + $0x7b8] ss:$24 sps:$4 sm:$0xff]   ;;  %v5158_v48 = vld [vmem:[#allocation10 + $0x48c] ss:$24 sps:$4 sm:$0xff]  }
 0x232   :  { %2818 = vmatpush1.bf16.msra.mxu1 %v5078_v2  ;;  %v5161_v2 = vld [vmem:[#allocation10 + $0x78c] ss:$24 sps:$4 sm:$0xff]  }
 0x233   :  { %2859 = vmatpush1.bf16.msra.mxu0 %v5081_v50  ;;  %2819 = vmatprep.subr.bf16.mxu1 %v5086_v61  ;;  %v5156_v50 = vld [vmem:[#allocation10 + $0x488] ss:$24 sps:$4 sm:$0xff]  }
 0x234   :  { %2860 = vmatprep.subr.bf16.mxu0 %v5089_v51  ;;  %v5159_v61 = vld [vmem:[#allocation10 + $0x788] ss:$24 sps:$4 sm:$0xff]   ;;  %v5164_v51 = vld [vmem:[#allocation10 + $0x164] ss:$24 sps:$4 sm:$0xff]  }
 0x236   :  { %2820 = vmatpush1.bf16.msra.mxu1 %v5084_v60  ;;  %v5167_v60 = vld [vmem:[#allocation10 + $0x464] ss:$24 sps:$4 sm:$0xff]  }
 0x237   :  { %2861 = vmatpush1.bf16.msra.mxu0 %v5087_v19  ;;  %2821 = vmatprep.subr.bf16.mxu1 %v5092_v52  ;;  %v5162_v19 = vld [vmem:[#allocation10 + $0x160] ss:$24 sps:$4 sm:$0xff]  }
 0x238   :  { %2862 = vmatprep.subr.bf16.mxu0 %v5095_v56  ;;  %v5165_v52 = vld [vmem:[#allocation10 + $0x460] ss:$24 sps:$4 sm:$0xff]   ;;  %v5170_v56 = vld [vmem:[#allocation10 + $0x134] ss:$24 sps:$4 sm:$0xff]  }
 0x23a   :  { %2822 = vmatpush1.bf16.msra.mxu1 %v5090_v49  ;;  %v5173_v49 = vld [vmem:[#allocation10 + $0x434] ss:$24 sps:$4 sm:$0xff]  }
 0x23b   :  { %2863 = vmatpush1.bf16.msra.mxu0 %v5093_v57  ;;  %2823 = vmatprep.subr.bf16.mxu1 %v5098_v38  ;;  %v5168_v57 = vld [vmem:[#allocation10 + $0x130] ss:$24 sps:$4 sm:$0xff]  }
 0x23c   :  { %2864 = vmatprep.subr.bf16.mxu0 %v5101_v58  ;;  %v5171_v38 = vld [vmem:[#allocation10 + $0x430] ss:$24 sps:$4 sm:$0xff]   ;;  %v5176_v58 = vld [vmem:[#allocation10 + $0x104] ss:$24 sps:$4 sm:$0xff]  }
 0x23e   :  { %2824 = vmatpush1.bf16.msra.mxu1 %v5096_v59  ;;  %v5179_v59 = vld [vmem:[#allocation10 + $0x404] ss:$24 sps:$4 sm:$0xff]  }
 0x23f   :  { %2865 = vmatpush1.bf16.msra.mxu0 %v5099_v63  ;;  %2825 = vmatprep.subr.bf16.mxu1 %v5104_v1  ;;  %v5174_v63 = vld [vmem:[#allocation10 + $0x100] ss:$24 sps:$4 sm:$0xff]  }
 0x240   :  { %2866 = vmatprep.subr.bf16.mxu0 %v5107_v4  ;;  %v5177_v1 = vld [vmem:[#allocation10 + $0x400] ss:$24 sps:$4 sm:$0xff]   ;;  %v5182_v4 = vld [vmem:[#allocation10 + $0xd4] ss:$24 sps:$4 sm:$0xff]  }
 0x242   :  { %2826 = vmatpush1.bf16.msra.mxu1 %v5102_v5  ;;  %v5185_v5 = vld [vmem:[#allocation10 + $0x3d4] ss:$24 sps:$4 sm:$0xff]  }
 0x243   :  { %2867 = vmatpush1.bf16.msra.mxu0 %v5105_v7  ;;  %2827 = vmatprep.subr.bf16.mxu1 %v5110_v32  ;;  %v5180_v7 = vld [vmem:[#allocation10 + $0xd0] ss:$24 sps:$4 sm:$0xff]   ;;  %v5188_v32 = vld [vmem:[#allocation10 + $0xa4] ss:$24 sps:$4 sm:$0xff]  }
 0x244   :  { %2868 = vmatprep.subr.bf16.mxu0 %v5113_v8  ;;  %v5191_v8 = vld [vmem:[#allocation10 + $0x3a4] ss:$24 sps:$4 sm:$0xff]  }
 0x246   :  { %2828 = vmatpush1.bf16.msra.mxu1 %v5108_v62  ;;  %v5189_v62 = vld [vmem:[#allocation10 + $0x3a0] ss:$24 sps:$4 sm:$0xff]  }
 0x247   :  { %2869 = vmatpush1.bf16.msra.mxu0 %v5111_v9  ;;  %2829 = vmatprep.subr.bf16.mxu1 %v5116_v10  ;;  %v5194_v9 = vld [vmem:[#allocation10 + $0x74] ss:$24 sps:$4 sm:$0xff]  }
 0x248   :  { %2870 = vmatprep.subr.bf16.mxu0 %v5119_v11  ;;  %v5197_v10 = vld [vmem:[#allocation10 + $0x374] ss:$24 sps:$4 sm:$0xff]   ;;  %v5192_v11 = vld [vmem:[#allocation10 + $0x70] ss:$24 sps:$4 sm:$0xff]  }
 0x24a   :  { %2830 = vmatpush2.bf16.msra.mxu1 %v5114_v12  ;;  %v5195_v12 = vld [vmem:[#allocation10 + $0x370] ss:$24 sps:$4 sm:$0xff]  }
 0x24b   :  { %2871 = vmatpush2.bf16.msra.mxu0 %v5117_v54  ;;  %2831 = vmatprep.subr.bf16.mxu1 %v5122_v13  ;;  %v5200_v54 = vld [vmem:[#allocation10 + $0x44] ss:$24 sps:$4 sm:$0xff]  }
 0x24c   :  { %2872 = vmatprep.subr.bf16.mxu0 %v5125_v14  ;;  %v5203_v13 = vld [vmem:[#allocation10 + $0x344] ss:$24 sps:$4 sm:$0xff]   ;;  %v5198_v14 = vld [vmem:[#allocation10 + $0x40] ss:$24 sps:$4 sm:$0xff]  }
 0x24e   :  { %2832 = vmatpush2.bf16.msra.mxu1 %v5120_v15  ;;  %v5201_v15 = vld [vmem:[#allocation10 + $0x340] ss:$24 sps:$4 sm:$0xff]  }
 0x24f   :  { %2873 = vmatpush2.bf16.msra.mxu0 %v5123_v16  ;;  %2833 = vmatprep.subr.bf16.mxu1 %v5128_v20  ;;  %v5206_v16 = vld [vmem:[#allocation10 + $0x14] ss:$24 sps:$4 sm:$0xff]  }
 0x250   :  { %2874 = vmatprep.subr.bf16.mxu0 %v5131_v21  ;;  %v5209_v20 = vld [vmem:[#allocation10 + $0x314] ss:$24 sps:$4 sm:$0xff]   ;;  %v5204_v21 = vld [vmem:[#allocation10 + $0x10] ss:$24 sps:$4 sm:$0xff]  }
 0x252   :  { %2834 = vmatpush2.bf16.msra.mxu1 %v5126_v22  ;;  %v5207_v22 = vld [vmem:[#allocation10 + $0x310] ss:$24 sps:$4 sm:$0xff]  }
 0x253   :  { %2875 = vmatpush2.bf16.msra.mxu0 %v5129_v25  ;;  %2835 = vmatprep.subr.bf16.mxu1 %v5134_v3  ;;  %v5212_v25 = vld [vmem:[#allocation10 + $0x2e4] ss:$24 sps:$4 sm:$0xff]  }
 0x254   :  { %2876 = vmatprep.subr.bf16.mxu0 %v5137_v28  ;;  %v5215_v3 = vld [vmem:[#allocation10 + $0x5e4] ss:$24 sps:$4 sm:$0xff]   ;;  %v5210_v28 = vld [vmem:[#allocation10 + $0x2e0] ss:$24 sps:$4 sm:$0xff]  }
 0x256   :  { %2836 = vmatpush2.bf16.msra.mxu1 %v5132_v29  ;;  %v5213_v29 = vld [vmem:[#allocation10 + $0x5e0] ss:$24 sps:$4 sm:$0xff]  }
 0x257   :  { %2877 = vmatpush2.bf16.msra.mxu0 %v5135_v6  ;;  %2837 = vmatprep.subr.bf16.mxu1 %v5140_v30  ;;  %v5218_v6 = vld [vmem:[#allocation10 + $0x2b4] ss:$24 sps:$4 sm:$0xff]  }
 0x258   :  { %2878 = vmatprep.subr.bf16.mxu0 %v5143_v31  ;;  %v5221_v30 = vld [vmem:[#allocation10 + $0x5b4] ss:$24 sps:$4 sm:$0xff]   ;;  %v5216_v31 = vld [vmem:[#allocation10 + $0x2b0] ss:$24 sps:$4 sm:$0xff]  }
 0x25a   :  { %2838 = vmatpush2.bf16.msra.mxu1 %v5138_v33  ;;  %v5219_v33 = vld [vmem:[#allocation10 + $0x5b0] ss:$24 sps:$4 sm:$0xff]  }
 0x25b   :  { %2879 = vmatpush2.bf16.msra.mxu0 %v5141_v34  ;;  %2839 = vmatprep.subr.bf16.mxu1 %v5146_v37  ;;  %v5224_v34 = vld [vmem:[#allocation10 + $0x284] ss:$24 sps:$4 sm:$0xff]  }
 0x25c   :  { %2880 = vmatprep.subr.bf16.mxu0 %v5149_v41  ;;  %v5227_v37 = vld [vmem:[#allocation10 + $0x584] ss:$24 sps:$4 sm:$0xff]   ;;  %v5222_v41 = vld [vmem:[#allocation10 + $0x280] ss:$24 sps:$4 sm:$0xff]  }
 0x25e   :  { %2840 = vmatpush2.bf16.msra.mxu1 %v5144_v35  ;;  %v5225_v35 = vld [vmem:[#allocation10 + $0x580] ss:$24 sps:$4 sm:$0xff]  }
 0x25f   :  { %2881 = vmatpush2.bf16.msra.mxu0 %v5147_v36  ;;  %2841 = vmatprep.subr.bf16.mxu1 %v5152_v43  ;;  %v5230_v36 = vld [vmem:[#allocation10 + $0x254] ss:$24 sps:$4 sm:$0xff]  }
 0x260   :  { %2882 = vmatprep.subr.bf16.mxu0 %v5155_v53  ;;  %v5233_v43 = vld [vmem:[#allocation10 + $0x554] ss:$24 sps:$4 sm:$0xff]   ;;  %v5228_v53 = vld [vmem:[#allocation10 + $0x250] ss:$24 sps:$4 sm:$0xff]  }
 0x262   :  { %2842 = vmatpush2.bf16.msra.mxu1 %v5150_v45  ;;  %v5231_v45 = vld [vmem:[#allocation10 + $0x550] ss:$24 sps:$4 sm:$0xff]  }
 0x263   :  { %2883 = vmatpush2.bf16.msra.mxu0 %v5153_v46  ;;  %2843 = vmatprep.subr.bf16.mxu1 %v5158_v48  ;;  %v5236_v46 = vld [vmem:[#allocation10 + $0x224] ss:$24 sps:$4 sm:$0xff]  }
 0x264   :  { %2884 = vmatprep.subr.bf16.mxu0 %v5161_v2  ;;  %v5239_v48 = vld [vmem:[#allocation10 + $0x524] ss:$24 sps:$4 sm:$0xff]   ;;  %v5234_v2 = vld [vmem:[#allocation10 + $0x220] ss:$24 sps:$4 sm:$0xff]  }
 0x266   :  { %2844 = vmatpush2.bf16.msra.mxu1 %v5156_v50  ;;  %v5237_v50 = vld [vmem:[#allocation10 + $0x520] ss:$24 sps:$4 sm:$0xff]  }
 0x267   :  { %2885 = vmatpush2.bf16.msra.mxu0 %v5159_v61  ;;  %2895 = vmatprep.subr.bf16.mxu1 %v5164_v51  ;;  %v5242_v61 = vld [vmem:[#allocation10 + $0x1f4] ss:$24 sps:$4 sm:$0xff]  }
 0x268   :  { %2936 = vmatprep.subr.bf16.mxu0 %v5167_v60  ;;  %v5245_v51 = vld [vmem:[#allocation10 + $0x4f4] ss:$24 sps:$4 sm:$0xff]   ;;  %v5240_v60 = vld [vmem:[#allocation10 + $0x1f0] ss:$24 sps:$4 sm:$0xff]  }
 0x269   :  { %2846 = vmatmul.mubr.bf16.vlgmr.msra.gmra.mxu1 %v5913_v24 }
 0x26a   :  { %2887 = vmatmul.mubr.bf16.vlgmr.msra.gmra.mxu0 %v5939_v42  ;;  %2896 = vmatpush1.bf16.msra.mxu1 %v5162_v19  ;;  %v5243_v19 = vld [vmem:[#allocation10 + $0x4f0] ss:$24 sps:$4 sm:$0xff]  }
 0x26b   :  { %2927 = vmatprep.mubr.bf16.mxu1 %v5907_v17  ;;  %2937 = vmatpush1.bf16.msra.mxu0 %v5165_v52  ;;  %v5183_v17 = vld [vmem:[#allocation10 + $0x3d0] ss:$24 sps:$4 sm:$0xff]   ;;  %v5248_v52 = vld [vmem:[#allocation10 + $0x1c4] ss:$24 sps:$4 sm:$0xff]  }
 0x26c   :  { %2968 = vmatprep.mubr.bf16.mxu0 %v5909_v18  ;;  %2897 = vmatprep.subr.bf16.mxu1 %v5170_v56  ;;  %v5186_v18 = vld [vmem:[#allocation10 + $0xa0] ss:$24 sps:$4 sm:$0xff]   ;;  %v5251_v56 = vld [vmem:[#allocation10 + $0x4c4] ss:$24 sps:$4 sm:$0xff]  }
 0x26d   :  { %2938 = vmatprep.subr.bf16.mxu0 %v5173_v49  ;;  %v5246_v49 = vld [vmem:[#allocation10 + $0x1c0] ss:$24 sps:$4 sm:$0xff]  }
 0x26e   :  { %2898 = vmatpush1.bf16.msra.mxu1 %v5168_v57  ;;  %v5249_v57 = vld [vmem:[#allocation10 + $0x4c0] ss:$24 sps:$4 sm:$0xff]  }
 0x26f   :  { %2939 = vmatpush1.bf16.msra.mxu0 %v5171_v38  ;;  %2899 = vmatprep.subr.bf16.mxu1 %v5176_v58  ;;  %v5254_v38 = vld [vmem:[#allocation10 + $0x194] ss:$24 sps:$4 sm:$0xff]  }
 0x270   :  { %2940 = vmatprep.subr.bf16.mxu0 %v5179_v59  ;;  %v5257_v58 = vld [vmem:[#allocation10 + $0x494] ss:$24 sps:$4 sm:$0xff]   ;;  %v5252_v59 = vld [vmem:[#allocation10 + $0x190] ss:$24 sps:$4 sm:$0xff]  }
 0x272   :  { %2900 = vmatpush1.bf16.msra.mxu1 %v5174_v63  ;;  %v5255_v63 = vld [vmem:[#allocation10 + $0x490] ss:$24 sps:$4 sm:$0xff]  }
 0x273   :  { %2941 = vmatpush1.bf16.msra.mxu0 %v5177_v1  ;;  %2901 = vmatprep.subr.bf16.mxu1 %v5182_v4  ;;  %v5260_v1 = vld [vmem:[#allocation10 + $0x764] ss:$24 sps:$4 sm:$0xff]  }
 0x274   :  { %2942 = vmatprep.subr.bf16.mxu0 %v5185_v5  ;;  %v5949_v4 = vld [vmem:[#allocation11] sm:$0x3f] }
 0x275   :  { %v5263_v5 = vld [vmem:[#allocation13 + $0x4c] ss:$16 sps:$4 sm:$0xff]  }
 0x276   :  { %2902 = vmatpush1.bf16.msra.mxu1 %v5180_v7  ;;  %v5258_v7 = vld [vmem:[#allocation10 + $0x760] ss:$24 sps:$4 sm:$0xff]  }
 0x277   :  { %2943 = vmatpush1.bf16.msra.mxu0 %v5183_v17  ;;  %2903 = vmatprep.subr.bf16.mxu1 %v5188_v32  ;;  %v1133_v17 = vrot.slane %v5949_v4, %v5795_v44  ;;  %v5261_v32 = vld [vmem:[#allocation13 + $0x48] ss:$16 sps:$4 sm:$0xff]  }
 0x278   :  { %2944 = vmatprep.subr.bf16.mxu0 %v5191_v8  ;;  %v1137_v8 = vrot.slane %v5949_v4, %v5791_v40 }
 0x27a   :  { %2904 = vmatpush1.bf16.msra.mxu1 %v5186_v18  ;;  %v5266_v18 = vld [vmem:[#allocation10 + $0x734] ss:$24 sps:$4 sm:$0xff]  }
 0x27b   :  { %2945 = vmatpush1.bf16.msra.mxu0 %v5189_v62  ;;  %2905 = vmatprep.subr.bf16.mxu1 %v5194_v9  ;;  %v5269_v62 = vld [vmem:[#allocation13 + $0x2c] ss:$16 sps:$4 sm:$0xff]  }
 0x27c   :  { %2946 = vmatprep.subr.bf16.mxu0 %v5197_v10 }
 0x27e   :  { %2906 = vmatpush1.bf16.msra.mxu1 %v5192_v11 }
 0x27f   :  { %2947 = vmatpush1.bf16.msra.mxu0 %v5195_v12  ;;  %2907 = vmatprep.subr.bf16.mxu1 %v5200_v54  ;;  %v5264_v12 = vld [vmem:[#allocation10 + $0x730] ss:$24 sps:$4 sm:$0xff]  }
 0x280   :  { %2948 = vmatprep.subr.bf16.mxu0 %v5203_v13 }
 0x282   :  { %2908 = vmatpush1.bf16.msra.mxu1 %v5198_v14  ;;  %v5267_v14 = vld [vmem:[#allocation13 + $0x28] ss:$16 sps:$4 sm:$0xff]  }
 0x283   :  { %2949 = vmatpush1.bf16.msra.mxu0 %v5201_v15  ;;  %2909 = vmatprep.subr.bf16.mxu1 %v5206_v16  ;;  %v5272_v15 = vld [vmem:[#allocation10 + $0x704] ss:$24 sps:$4 sm:$0xff]  }
 0x284   :  { %2950 = vmatprep.subr.bf16.mxu0 %v5209_v20 }
 0x286   :  { %2910 = vmatpush1.bf16.msra.mxu1 %v5204_v21 }
 0x287   :  { %2951 = vmatpush1.bf16.msra.mxu0 %v5207_v22  ;;  %2911 = vmatprep.subr.bf16.mxu1 %v5212_v25  ;;  %v5270_v25 = vld [vmem:[#allocation10 + $0x700] ss:$24 sps:$4 sm:$0xff]  }
 0x288   :  { %2952 = vmatprep.subr.bf16.mxu0 %v5215_v3 }
 0x28a   :  { %2912 = vmatpush2.bf16.msra.mxu1 %v5210_v28 }
 0x28b   :  { %2953 = vmatpush2.bf16.msra.mxu0 %v5213_v29  ;;  %2913 = vmatprep.subr.bf16.mxu1 %v5218_v6  ;;  %v5278_v29 = vld [vmem:[#allocation10 + $0x6d4] ss:$24 sps:$4 sm:$0xff]   ;;  %v3024_v6 = vld [vmem:[#allocation8] sm:$0xff] }
 0x28c   :  { %2954 = vmatprep.subr.bf16.mxu0 %v5221_v30  ;;  %v3025_v30 = vld [vmem:[#allocation8 + $0x8] sm:$0xff] }
 0x28e   :  { %2914 = vmatpush2.bf16.msra.mxu1 %v5216_v31  ;;  %v5276_v31 = vld [vmem:[#allocation10 + $0x6d0] ss:$24 sps:$4 sm:$0xff]  }
 0x28f   :  { %2955 = vmatpush2.bf16.msra.mxu0 %v5219_v33  ;;  %2915 = vmatprep.subr.bf16.mxu1 %v5224_v34  ;;  %v5963_v33 = vpack.c.bf16 %v3025_v30, %v3024_v6  ;;  %v5281_v34 = vld [vmem:[#allocation10 + $0x6a4] ss:$24 sps:$4 sm:$0xff]  }
 0x290   :  { %2956 = vmatprep.subr.bf16.mxu0 %v5227_v37  ;;  %v5279_v37 = vld [vmem:[#allocation10 + $0x6a0] ss:$24 sps:$4 sm:$0xff]  }
 0x291   :  { %v5334_v6 = vld [vmem:[#allocation16 + $0x250] sm:$0xff]  }
 0x292   :  { %2916 = vmatpush2.bf16.msra.mxu1 %v5222_v41  ;;  %v5284_v41 = vld [vmem:[#allocation10 + $0x674] ss:$24 sps:$4 sm:$0xff]   ;;  %v5335_v30 = vld [vmem:[#allocation16 + $0x210] sm:$0xff]  }
 0x293   :  { %2957 = vmatpush2.bf16.msra.mxu0 %v5225_v35  ;;  %2917 = vmatprep.subr.bf16.mxu1 %v5230_v36  ;;  %v3026_v35 = vld [vmem:[#allocation8 + $0x10] sm:$0xff]  ;;  %v3027_v36 = vld [vmem:[#allocation8 + $0x18] sm:$0xff] }
 0x294   :  { %2958 = vmatprep.subr.bf16.mxu0 %v5233_v43  ;;  %v5282_v43 = vld [vmem:[#allocation10 + $0x670] ss:$24 sps:$4 sm:$0xff]  }
 0x296   :  { %2918 = vmatpush2.bf16.msra.mxu1 %v5228_v53  ;;  %v5968_v53 = vpack.c.bf16 %v3027_v36, %v3026_v35  ;;  %v1141_v35 = vrot.slane %v5949_v4, %v5839_v26  ;;  %v1145_v36 = vrot.slane %v5949_v4, %v5842_v27 }
 0x297   :  { %2959 = vmatpush2.bf16.msra.mxu0 %v5231_v45  ;;  %2919 = vmatprep.subr.bf16.mxu1 %v5236_v46  ;;  %v5287_v45 = vld [vmem:[#allocation10 + $0x644] ss:$24 sps:$4 sm:$0xff]   ;;  %v5285_v46 = vld [vmem:[#allocation10 + $0x640] ss:$24 sps:$4 sm:$0xff]  }
 0x298   :  { %2960 = vmatprep.subr.bf16.mxu0 %v5239_v48  ;;  %v5290_v48 = vld [vmem:[#allocation10 + $0x614] ss:$24 sps:$4 sm:$0xff]  }
 0x29a   :  { %2920 = vmatpush2.bf16.msra.mxu1 %v5234_v2  ;;  %v5288_v2 = vld [vmem:[#allocation10 + $0x610] ss:$24 sps:$4 sm:$0xff]  }
 0x29b   :  { %2961 = vmatpush2.bf16.msra.mxu0 %v5237_v50  ;;  %2921 = vmatprep.subr.bf16.mxu1 %v5242_v61  ;;  %v5293_v50 = vld [vmem:[#allocation10 + $0x8e4] ss:$24 sps:$4 sm:$0xff]   ;;  %v5291_v61 = vld [vmem:[#allocation10 + $0x8e0] ss:$24 sps:$4 sm:$0xff]  }
 0x29c   :  { %2962 = vmatprep.subr.bf16.mxu0 %v5245_v51  ;;  %v5296_v51 = vld [vmem:[#allocation10 + $0x8b4] ss:$24 sps:$4 sm:$0xff]  }
 0x29e   :  { %2922 = vmatpush2.bf16.msra.mxu1 %v5240_v60  ;;  %v5294_v60 = vld [vmem:[#allocation10 + $0x8b0] ss:$24 sps:$4 sm:$0xff]  }
 0x29f   :  { %2963 = vmatpush2.bf16.msra.mxu0 %v5243_v19  ;;  %2923 = vmatprep.subr.bf16.mxu1 %v5248_v52  ;;  %v5299_v19 = vld [vmem:[#allocation10 + $0x884] ss:$24 sps:$4 sm:$0xff]   ;;  %v5297_v52 = vld [vmem:[#allocation10 + $0x880] ss:$24 sps:$4 sm:$0xff]  }
 0x2a0   :  { %2964 = vmatprep.subr.bf16.mxu0 %v5251_v56  ;;  %v5302_v56 = vld [vmem:[#allocation10 + $0x854] ss:$24 sps:$4 sm:$0xff]  }
 0x2a2   :  { %2924 = vmatpush2.bf16.msra.mxu1 %v5246_v49  ;;  %v5300_v49 = vld [vmem:[#allocation10 + $0x850] ss:$24 sps:$4 sm:$0xff]  }
 0x2a3   :  { %2965 = vmatpush2.bf16.msra.mxu0 %v5249_v57  ;;  %2925 = vmatprep.subr.bf16.mxu1 %v5254_v38  ;;  %v5305_v57 = vld [vmem:[#allocation10 + $0x824] ss:$24 sps:$4 sm:$0xff]   ;;  %v5303_v38 = vld [vmem:[#allocation10 + $0x820] ss:$24 sps:$4 sm:$0xff]  }
 0x2a4   :  { %2966 = vmatprep.subr.bf16.mxu0 %v5257_v58  ;;  %v5308_v58 = vld [vmem:[#allocation10 + $0x7f4] ss:$24 sps:$4 sm:$0xff]  }
 0x2a6   :  { %2926 = vmatpush2.bf16.msra.mxu1 %v5252_v59  ;;  %v5306_v59 = vld [vmem:[#allocation10 + $0x7f0] ss:$24 sps:$4 sm:$0xff]  }
 0x2a7   :  { %2967 = vmatpush2.bf16.msra.mxu0 %v5255_v63  ;;  %2977 = vmatprep.subr.bf16.mxu1 %v5260_v1  ;;  %v5311_v63 = vld [vmem:[#allocation10 + $0x7c4] ss:$24 sps:$4 sm:$0xff]   ;;  %v5309_v1 = vld [vmem:[#allocation10 + $0x7c0] ss:$24 sps:$4 sm:$0xff]  }
 0x2a8   :  { %3194 = vmatprep.subr.bf16.mxu0 %v5263_v5  ;;  %v5314_v5 = vld [vmem:[#allocation10 + $0x794] ss:$24 sps:$4 sm:$0xff]  }
 0x2a9   :  { %2928 = vmatmul.mubr.bf16.vlgmr.msra.gmra.mxu1 %v5911_v23  ;;  %v2683_v9 = vpop.f32.mrf.mxu1  ;;  %v2724_v10 = vpop.f32.mrf.mxu0  ;;  %v5275_v23 = vld [vmem:[#allocation13 + $0xc] ss:$16 sps:$4 sm:$0xff]  }
 0x2aa   :  { %2969 = vmatmul.mubr.bf16.vlgmr.msra.gmra.mxu0 %v5913_v24  ;;  %v2684_v11 = vadd.f32 %v2683_v9, %v1133_v17  ;;  %2978 = vmatpush1.bf16.msra.mxu1 %v5258_v7  ;;  %v5312_v7 = vld [vmem:[#allocation10 + $0x790] ss:$24 sps:$4 sm:$0xff]  }
 0x2ab   :  { %3009 = vmatprep.mubr.bf16.mxu1 %v5934_v47  ;;  %3195 = vmatpush1.bf16.msra.mxu0 %v5261_v32  ;;  %v2685_v54 = vpop.f32.mrf.mxu1  ;;  %v2726_v13 = vpop.f32.mrf.mxu0  ;;  %v5273_v47 = vld [vmem:[#allocation13 + $0x8] ss:$16 sps:$4 sm:$0xff]   ;;  %v5317_v17 = vld [vmem:[#allocation13 + $0x44] ss:$16 sps:$4 sm:$0xff]   ;;  %v5315_v32 = vld [vmem:[#allocation13 + $0x40] ss:$16 sps:$4 sm:$0xff]  }
 0x2ac   :  { %v5958_v16 = vadd.f32 %v2724_v10, %v2684_v11  ;;  %v2686_v20 = vadd.f32 %v2685_v54, %v1137_v8  ;;  %2979 = vmatprep.subr.bf16.mxu1 %v5266_v18  ;;  %3196 = vmatprep.subr.bf16.mxu0 %v5269_v62  ;;  %v5320_v8 = vld [vmem:[#allocation13 + $0x24] ss:$16 sps:$4 sm:$0xff]   ;;  %v5318_v10 = vld [vmem:[#allocation13 + $0x20] ss:$16 sps:$4 sm:$0xff]  }
 0x2ad   :  { %v2687_v21 = vpop.f32.mrf.mxu1  ;;  %v2728_v22 = vpop.f32.mrf.mxu0  ;;  %3216 = vmatprep.mubr.bf16.mxu0 %v5671_v0  ;;  %v5323_v54 = vld [vmem:[#allocation13 + $0x4] ss:$16 sps:$4 sm:$0xff]  }
 0x2ae   :  { %v5961_v24 = vadd.f32 %v2726_v13, %v2686_v20  ;;  %2980 = vmatpush1.bf16.msra.mxu1 %v5264_v12  ;;  %v5321_v20 = vld [vmem:[#allocation13] ss:$16 sps:$4 sm:$0xff]   ;;  %v5326_v22 = vld [vmem:[#allocation16 + $0x270] sm:$0xff]  }
 0x2af   :  { %3197 = vmatpush1.bf16.msra.mxu0 %v5267_v14  ;;  %v2688_v3 = vpop.f32.mrf.mxu1  ;;  %v2729_v28 = vpop.f32.mrf.mxu0  ;;  %2981 = vmatprep.subr.bf16.mxu1 %v5272_v15  ;;  %v5325_v21 = vld [vmem:[#allocation16 + $0x238] sm:$0xff]  }
 0x2b0   :  { %3198 = vmatprep.subr.bf16.mxu0 %v5275_v23  ;;  %v5330_v3 = vld [vmem:[#allocation16 + $0x260] sm:$0xff]  }
 0x2b1   :  { %v5331_v28 = vld [vmem:[#allocation16 + $0x220] sm:$0xff]  }
 0x2b2   :  { %2982 = vmatpush1.bf16.msra.mxu1 %v5270_v25  ;;  %v5328_v25 = vld [vmem:[#allocation16 + $0x268] sm:$0xff]  }
 0x2b3   :  { %3199 = vmatpush1.bf16.msra.mxu0 %v5273_v47  ;;  %2983 = vmatprep.subr.bf16.mxu1 %v5278_v29  ;;  %v5329_v47 = vld [vmem:[#allocation16 + $0x228] sm:$0xff]   ;;  %v5333_v29 = vld [vmem:[#allocation16 + $0x218] sm:$0xff]  }
 0x2b6   :  { %4586 = vmatmul.mubr.msk.bf16.vlgmr.msra.gmra.mxu0 %vm3124_vm5, %v5963_v33  ;;  %2984 = vmatpush1.bf16.msra.mxu1 %v5276_v31  ;;  %v5336_v31 = vld [vmem:[#allocation16 + $0x248] sm:$0xff]  }
 0x2b7   :  { %2985 = vmatprep.subr.bf16.mxu1 %v5281_v34  ;;  %3226 = vmatprep.mubr.bf16.mxu0 %v5671_v0  ;;  %v5338_v34 = vld [vmem:[#allocation16 + $0x240] sm:$0xff]  }
 0x2ba   :  { %2986 = vmatpush1.bf16.msra.mxu1 %v5279_v37  ;;  %v5339_v37 = vld [vmem:[#allocation16 + $0x200] sm:$0xff]  }
 0x2bb   :  { %2987 = vmatprep.subr.bf16.mxu1 %v5284_v41  ;;  %v5340_v41 = vld [vmem:[#allocation16 + $0xf8] sm:$0xff]  }
 0x2be   :  { %4587 = vmatmul.mubr.msk.bf16.gmra.mxu0 %vm3124_vm5, %v5968_v53  ;;  %2988 = vmatpush1.bf16.msra.mxu1 %v5282_v43 }
 0x2bf   :  { %2989 = vmatprep.subr.bf16.mxu1 %v5287_v45 }
 0x2c2   :  { %2990 = vmatpush1.bf16.msra.mxu1 %v5285_v46 }
 0x2c3   :  { %2991 = vmatprep.subr.bf16.mxu1 %v5290_v48 }
 0x2c6   :  { %2992 = vmatpush1.bf16.msra.mxu1 %v5288_v2 }
 0x2c7   :  { %2993 = vmatprep.subr.bf16.mxu1 %v5293_v50 }
 0x2ca   :  { %2994 = vmatpush2.bf16.msra.mxu1 %v5291_v61 }
 0x2cb   :  { %2995 = vmatprep.subr.bf16.mxu1 %v5296_v51 }
 0x2ce   :  { %2996 = vmatpush2.bf16.msra.mxu1 %v5294_v60 }
 0x2cf   :  { %2997 = vmatprep.subr.bf16.mxu1 %v5299_v19 }
 0x2d2   :  { %2998 = vmatpush2.bf16.msra.mxu1 %v5297_v52 }
 0x2d3   :  { %2999 = vmatprep.subr.bf16.mxu1 %v5302_v56 }
 0x2d6   :  { %3000 = vmatpush2.bf16.msra.mxu1 %v5300_v49 }
 0x2d7   :  { %3001 = vmatprep.subr.bf16.mxu1 %v5305_v57  ;;  %v5356_v57 = vld [vmem:[#allocation16 + $0x1f8] sm:$0xff]  }
 0x2d8   :  { %4669 = vmatprep.subr.bf16.mxu0 %v5356_v57 }
 0x2da   :  { %3002 = vmatpush2.bf16.msra.mxu1 %v5303_v38  ;;  %v5357_v38 = vld [vmem:[#allocation16 + $0x1b8] sm:$0xff]  }
 0x2db   :  { %3003 = vmatprep.subr.bf16.mxu1 %v5308_v58  ;;  %4670 = vmatpush3.bf16.msra.mxu0 %v5357_v38  ;;  %v5358_v58 = vld [vmem:[#allocation16 + $0x1f0] sm:$0xff]  }
 0x2dc   :  { %4671 = vmatprep.subr.bf16.mxu0 %v5358_v58 }
 0x2de   :  { %3004 = vmatpush2.bf16.msra.mxu1 %v5306_v59  ;;  %v5359_v59 = vld [vmem:[#allocation16 + $0x1b0] sm:$0xff]  }
 0x2df   :  { %3005 = vmatprep.subr.bf16.mxu1 %v5311_v63  ;;  %4672 = vmatpush3.bf16.msra.mxu0 %v5359_v59  ;;  %v5360_v63 = vld [vmem:[#allocation16 + $0x1e8] sm:$0xff]  }
 0x2e0   :  { %4673 = vmatprep.subr.bf16.mxu0 %v5360_v63 }
 0x2e2   :  { %3006 = vmatpush2.bf16.msra.mxu1 %v5309_v1  ;;  %v5361_v1 = vld [vmem:[#allocation16 + $0x1a8] sm:$0xff]  }
 0x2e3   :  { %3007 = vmatprep.subr.bf16.mxu1 %v5314_v5  ;;  %4674 = vmatpush3.bf16.msra.mxu0 %v5361_v1  ;;  %v5362_v5 = vld [vmem:[#allocation16 + $0x1e0] sm:$0xff]  }
 0x2e4   :  { %4675 = vmatprep.subr.bf16.mxu0 %v5362_v5 }
 0x2e6   :  { %3008 = vmatpush2.bf16.msra.mxu1 %v5312_v7  ;;  %v5363_v7 = vld [vmem:[#allocation16 + $0x1a0] sm:$0xff]  }
 0x2e7   :  { %3141 = vmatprep.subr.bf16.mxu1 %v5317_v17  ;;  %4676 = vmatpush3.bf16.msra.mxu0 %v5363_v7  ;;  %v5364_v17 = vld [vmem:[#allocation16 + $0x1d8] sm:$0xff]  }
 0x2e8   :  { %4677 = vmatprep.subr.bf16.mxu0 %v5364_v17 }
 0x2e9   :  { %v2765_v18 = vpop.f32.mrf.mxu1  ;;  %v2806_v62 = vpop.f32.mrf.mxu0  ;;  %3010 = vmatmul.mubr.bf16.vlgmr.msra.gmra.mxu1 %v5939_v42 }
 0x2ea   :  { %v5974_v9 = vadd.f32 %v2765_v18, %v5958_v16  ;;  %3142 = vmatpush1.bf16.msra.mxu1 %v5315_v32  ;;  %3163 = vmatprep.mubr.bf16.mxu1 %v5671_v0  ;;  %v5324_v16 = vld [vmem:[#allocation16 + $0x278] sm:$0xff]   ;;  %v2807_v43 = vadd.f32 %v2806_v62, %v1141_v35  ;;  %v5367_v18 = vld [vmem:[#allocation16 + $0x190] sm:$0xff]   ;;  %v5368_v62 = vld [vmem:[#allocation16 + $0x1c8] sm:$0xff]  }
 0x2eb   :  { %v2767_v11 = vpop.f32.mrf.mxu1  ;;  %v2808_v12 = vpop.f32.mrf.mxu0  ;;  %3143 = vmatprep.subr.bf16.mxu1 %v5320_v8  ;;  %v5365_v32 = vld [vmem:[#allocation16 + $0x198] sm:$0xff]   ;;  %v5366_v8 = vld [vmem:[#allocation16 + $0x1d0] sm:$0xff]  }
 0x2ec   :  { %v5978_v13 = vadd.f32 %v2767_v11, %v5961_v24  ;;  %v5327_v24 = vld [vmem:[#allocation16 + $0x230] sm:$0xff]   ;;  %v2809_v45 = vadd.f32 %v2808_v12, %v1145_v36  ;;  %4678 = vmatpush3.bf16.msra.mxu0 %v5365_v32  ;;  %v5370_v11 = vld [vmem:[#allocation16 + $0x1c0] sm:$0xff]  }
 0x2ed   :  { %v2769_v14 = vpop.f32.mrf.mxu1  ;;  %v2810_v15 = vpop.f32.mrf.mxu0  ;;  %4679 = vmatprep.subr.bf16.mxu0 %v5366_v8  ;;  %v5371_v12 = vld [vmem:[#allocation16 + $0x180] sm:$0xff]  }
 0x2ee   :  { %3144 = vmatpush1.bf16.msra.mxu1 %v5318_v10  ;;  %v5369_v10 = vld [vmem:[#allocation16 + $0x188] sm:$0xff]   ;;  %v1149_v14 = vrot.slane %v5949_v4, %v5807_v55  ;;  %v1153_v15 = vrot.slane %v5949_v4, %v5893_v39 }
 0x2ef   :  { %v2770_v23 = vpop.f32.mrf.mxu1  ;;  %v2811_v42 = vpop.f32.mrf.mxu0  ;;  %3145 = vmatprep.subr.bf16.mxu1 %v5323_v54  ;;  %v5372_v54 = vld [vmem:[#allocation16 + $0x78] sm:$0xff]  }
 0x2f0   :  { %4680 = vmatpush3.bf16.msra.mxu0 %v5367_v18 }
 0x2f1   :  { %4681 = vmatprep.subr.bf16.mxu0 %v5368_v62 }
 0x2f2   :  { %3146 = vmatpush1.bf16.msra.mxu1 %v5321_v20 }
 0x2f3   :  { %4691 = vmatprep.subr.bf16.mxu1 %v5324_v16 }
 0x2f4   :  { %4682 = vmatpush3.bf16.msra.mxu0 %v5369_v10 }
 0x2f5   :  { %4584 = vmatmul.mubr.msk.bf16.vlgmr.msra.gmra.mxu1 %vm3124_vm5, %v5963_v33  ;;  %v5337_v33 = vld [vmem:[#allocation16 + $0x208] sm:$0xff]   ;;  %4683 = vmatprep.subr.bf16.mxu0 %v5370_v11 }
 0x2f6   :  { %3173 = vmatprep.mubr.bf16.mxu1 %v5671_v0  ;;  %4692 = vmatpush3.bf16.msra.mxu1 %v5325_v21  ;;  %v5332_v0 = vld [vmem:[#allocation16 + $0x258] sm:$0xff]  }
 0x2f7   :  { %4693 = vmatprep.subr.bf16.mxu1 %v5326_v22 }
 0x2f8   :  { %4684 = vmatpush3.bf16.msra.mxu0 %v5371_v12 }
 0x2f9   :  { %4713 = vmatprep.subr.bf16.mxu0 %v5372_v54 }
 0x2fa   :  { %4694 = vmatpush3.bf16.msra.mxu1 %v5327_v24 }
 0x2fb   :  { %4695 = vmatprep.subr.bf16.mxu1 %v5328_v25 }
 0x2fd   :  { %4585 = vmatmul.mubr.msk.bf16.gmra.mxu1 %vm3124_vm5, %v5968_v53 }
 0x2fe   :  { %4696 = vmatpush3.bf16.msra.mxu1 %v5329_v47 }
 0x2ff   :  { %4697 = vmatprep.subr.bf16.mxu1 %v5330_v3 }
 0x302   :  { %4698 = vmatpush3.bf16.msra.mxu1 %v5331_v28 }
 0x303   :  { %4699 = vmatprep.subr.bf16.mxu1 %v5332_v0 }
 0x306   :  { %4700 = vmatpush3.bf16.msra.mxu1 %v5333_v29  ;;  %v6001_v29 = vld [vmem:[#allocation14] sm:$0xf] }
 0x307   :  { %4701 = vmatprep.subr.bf16.mxu1 %v5334_v6  ;;  %v3055_v55 = vrot.slane %v6001_v29, %v5839_v26  ;;  %v3059_v39 = vrot.slane %v6001_v29, %v5842_v27 }
 0x30a   :  { %4702 = vmatpush3.bf16.msra.mxu1 %v5335_v30 }
 0x30b   :  { %4703 = vmatprep.subr.bf16.mxu1 %v5336_v31 }
 0x30e   :  { %4704 = vmatpush3.bf16.msra.mxu1 %v5337_v33 }
 0x30f   :  { %4705 = vmatprep.subr.bf16.mxu1 %v5338_v34 }
 0x312   :  { %4706 = vmatpush3.bf16.msra.mxu1 %v5339_v37 }
 0x313   :  { %4735 = vmatprep.subr.bf16.mxu1 %v5340_v41 }
 0x329   :  { %v2847_v53 = vpop.f32.mrf.mxu1 }
 0x32a   :  { %v2848_v46 = vadd.f32 %v2847_v53, %v2807_v43  ;;  %v2888_v48 = vpop.f32.mrf.mxu0 }
 0x32b   :  { %v2849_v2 = vpop.f32.mrf.mxu1 }
 0x32c   :  { %v5989_v50 = vadd.f32 %v2888_v48, %v2848_v46  ;;  %v2850_v61 = vadd.f32 %v2849_v2, %v2809_v45  ;;  %v2890_v51 = vpop.f32.mrf.mxu0 }
 0x32d   :  { %v2851_v60 = vpop.f32.mrf.mxu1 }
 0x32e   :  { %v5991_v19 = vadd.f32 %v2890_v51, %v2850_v61  ;;  %v2892_v52 = vpop.f32.mrf.mxu0 }
 0x32f   :  { %v2852_v56 = vpop.f32.mrf.mxu1 }
 0x330   :  { %v2893_v49 = vpop.f32.mrf.mxu0  ;;  %5406 = vtanh.f32 %v5991_v19 }
 0x331   :  { %5408 = vtanh.f32 %v5989_v50 }
 0x332   :  { %5410 = vtanh.f32 %v5978_v13 }
 0x333   :  { %5412 = vtanh.f32 %v5974_v9  ;;  %v5389_v9 = vld [vmem:[#allocation16 + $0x138] sm:$0xff]  }
 0x369   :  { %v2929_v20 = vpop.f32.mrf.mxu1 }
 0x36a   :  { %v2930_v23 = vadd.f32 %v2929_v20, %v1149_v14  ;;  %v2970_v42 = vpop.f32.mrf.mxu0 }
 0x36b   :  { %v2931_v16 = vpop.f32.mrf.mxu1 }
 0x36c   :  { %v5997_v21 = vadd.f32 %v2970_v42, %v2930_v23  ;;  %v2932_v22 = vadd.f32 %v2931_v16, %v1153_v15  ;;  %v2972_v24 = vpop.f32.mrf.mxu0 }
 0x36d   :  { %v2933_v25 = vpop.f32.mrf.mxu1 }
 0x36e   :  { %v5999_v47 = vadd.f32 %v2972_v24, %v2932_v22  ;;  %v2974_v3 = vpop.f32.mrf.mxu0 }
 0x36f   :  { %v2934_v28 = vpop.f32.mrf.mxu1 }
 0x370   :  { %v2975_v0 = vpop.f32.mrf.mxu0 }
 0x376   :  { %v3218_v4 = vpop.f32.mrf.mxu0 }
 0x377   :  { %v3219_v6 = vadd.f32 %v3218_v4, %v3055_v55 }
 0x378   :  { %v3220_v30 = vpop.f32.mrf.mxu0 }
 0x379   :  { %v3221_v31 = vadd.f32 %v3220_v30, %v3059_v39  ;;  %v3239_v34 = vmax.f32 %v3219_v6, 0.0 }
 0x37a   :  { %v3222_v33 = vpop.f32.mrf.mxu0 }
 0x37b   :  { %v3223_v37 = vadd.f32 %v3222_v33, %v3055_v55  ;;  %v3240_v35 = vmax.f32 %v3221_v31, 0.0 }
 0x37c   :  { %v3224_v41 = vpop.f32.mrf.mxu0 }
 0x37d   :  { %v3243_v36 = vmax.f32 %v3223_v37, 0.0  ;;  %v3225_v43 = vadd.f32 %v3224_v41, %v3059_v39 }
 0x37e   :  { %v3228_v53 = vpop.f32.mrf.mxu0 }
 0x37f   :  { %v3267_v45 = vadd.f32 %v3243_v36, %v3239_v34  ;;  %v3244_v46 = vmax.f32 %v3225_v43, 0.0  ;;  %v3229_v48 = vadd.f32 %v3228_v53, %v3055_v55  ;;  %v5407_v43 = vpop.eup %5406 }
 0x380   :  { %v3230_v2 = vpop.f32.mrf.mxu0 }
 0x381   :  { %v3268_v26 = vrot.slane %v3267_v45, 4  ;;  %v3274_v61 = vadd.f32 %v3244_v46, %v3240_v35  ;;  %v3231_v51 = vadd.f32 %v3230_v2, %v3059_v39  ;;  %v3247_v56 = vmax.f32 %v3229_v48, 0.0  ;;  %v5341_v46 = vld [vmem:[#allocation16 + $0xb8] sm:$0xff]   ;;  %v5342_v48 = vld [vmem:[#allocation16 + $0xf0] sm:$0xff]  }
 0x382   :  { %v3232_v27 = vpop.f32.mrf.mxu0  ;;  %v3480_v2 = vpack.c.bf16 %v5407_v43, %v5407_v43 }
 0x383   :  { %v3269_v60 = vadd.f32 %v3268_v26, %v3267_v45  ;;  %v3275_v52 = vrot.slane %v3274_v61, 4  ;;  %v3233_v49 = vadd.f32 %v3232_v27, %v3055_v55  ;;  %v3248_v57 = vmax.f32 %v3231_v51, 0.0  ;;  %v5343_v26 = vld [vmem:[#allocation16 + $0xb0] sm:$0xff]   ;;  %v5345_v51 = vld [vmem:[#allocation16 + $0xa8] sm:$0xff]   ;;  %v5346_v27 = vld [vmem:[#allocation16 + $0xe0] sm:$0xff]  }
 0x384   :  { %v3234_v38 = vpop.f32.mrf.mxu0 }
 0x385   :  { %v3270_v58 = vrot.slane %v3269_v60, 2  ;;  %v3276_v59 = vadd.f32 %v3275_v52, %v3274_v61  ;;  %v3251_v63 = vmax.f32 %v3233_v49, 0.0  ;;  %v3235_v1 = vadd.f32 %v3234_v38, %v3059_v39  ;;  %v5344_v61 = vld [vmem:[#allocation16 + $0xe8] sm:$0xff]  }
 0x387   :  { %v3271_v5 = vadd.f32 %v3270_v58, %v3269_v60  ;;  %v3277_v7 = vrot.slane %v3276_v59, 2  ;;  %v3295_v17 = vadd.f32 %v3251_v63, %v3247_v56  ;;  %v3252_v32 = vmax.f32 %v3235_v1, 0.0  ;;  %v5347_v56 = vld [vmem:[#allocation16 + $0xa0] sm:$0xff]   ;;  %v5350_v1 = vld [vmem:[#allocation16 + $0xd0] sm:$0xff]  }
 0x389   :  { %v3272_v8 = vrot.slane %v3271_v5, 1  ;;  %v3278_v18 = vadd.f32 %v3277_v7, %v3276_v59  ;;  %v3296_v62 = vrot.slane %v3295_v17, 4  ;;  %v3302_v10 = vadd.f32 %v3252_v32, %v3248_v57  ;;  %v5348_v57 = vld [vmem:[#allocation16 + $0xd8] sm:$0xff]   ;;  %v5353_v32 = vld [vmem:[#allocation16 + $0x88] sm:$0xff]  }
 0x38a   :  { %v5349_v59 = vld [vmem:[#allocation16 + $0x98] sm:$0xff]   ;;  %v3047_v7 = vrot.slane %v6001_v29, %v5795_v44 }
 0x38b   :  { %v3273_v11 = vadd.f32 %v3272_v8, %v3271_v5  ;;  %v3279_v12 = vrot.slane %v3278_v18, 1  ;;  %v3297_v54 = vadd.f32 %v3296_v62, %v3295_v17  ;;  %v3303_v14 = vrot.slane %v3302_v10, 4  ;;  %v5351_v5 = vld [vmem:[#allocation16 + $0x90] sm:$0xff]  }
 0x38d   :  { %v3280_v15 = vadd.f32 %v3279_v12, %v3278_v18  ;;  %v3298_v20 = vrot.slane %v3297_v54, 2  ;;  %v3304_v23 = vadd.f32 %v3303_v14, %v3302_v10  ;;  %v3311_v42 = vmul.f32 0.0625, %v3273_v11  ;;  %v5354_v18 = vld [vmem:[#allocation16 + $0xc0] sm:$0xff]   ;;  %v5409_v14 = vpop.eup %5408 }
 0x38e   :  { %v5355_v12 = vld [vmem:[#allocation16 + $0x80] sm:$0xff]   ;;  %v5411_v13 = vpop.eup %5410 }
 0x38f   :  { %v3299_v16 = vadd.f32 %v3298_v20, %v3297_v54  ;;  %v3305_v22 = vrot.slane %v3304_v23, 2  ;;  %v3312_v24 = vmul.f32 0.0625, %v3280_v15  ;;  %v3485_v28 = vpack.c.bf16 %v3311_v42, %v3311_v42 }
 0x391   :  { %v3300_v25 = vrot.slane %v3299_v16, 1  ;;  %v3306_v3 = vadd.f32 %v3305_v22, %v3304_v23  ;;  %v3486_v6 = vpack.c.bf16 %v3312_v24, %v3312_v24  ;;  %v3501_v30 = vunpack.c.l.b16 %v3485_v28 }
 0x393   :  { %v3301_v0 = vadd.f32 %v3300_v25, %v3299_v16  ;;  %v3307_v55 = vrot.slane %v3306_v3, 1  ;;  %v3502_v41 = vunpack.c.l.b16 %v3486_v6 }
 0x395   :  { %v3315_v39 = vmul.f32 0.0625, %v3301_v0  ;;  %v3308_v4 = vadd.f32 %v3307_v55, %v3306_v3 }
 0x397   :  { %v3489_v31 = vpack.c.bf16 %v3315_v39, %v3315_v39  ;;  %v3316_v33 = vmul.f32 0.0625, %v3308_v4 }
 0x399   :  { %v3505_v34 = vunpack.c.l.b16 %v3489_v31  ;;  %v3490_v37 = vpack.c.bf16 %v3316_v33, %v3316_v33 }
 0x39b   :  { %v3506_v35 = vunpack.c.l.b16 %v3490_v37  ;;  %v3509_v36 = vsel %vm1185_vm4, %v3505_v34, %v3501_v30 }
 0x39c   :  { %v3513_v53 = vpack.c.b16 %v3509_v36, %v3509_v36 }
 0x39d   :  { %v3510_v19 = vsel %vm1185_vm4, %v3506_v35, %v3502_v41 }
 0x39e   :  { %v3514_v45 = vpack.c.b16 %v3510_v19, %v3510_v19 }
 0x3a0   :  { %3783 = vmatprep.mubr.bf16.mxu1 %v3514_v45 }
 0x3a1   :  { %3784 = vmatmul.mubr.bf16.vlgmr.msra.gmra.mxu1 %v3513_v53 }
 0x3a2   :  { %4736 = vmatpush3.bf16.msra.mxu1 %v5341_v46  ;;  %4151 = vmatprep.mubr.bf16.mxu1 %v3480_v2 }
 0x3a3   :  { %4737 = vmatprep.subr.bf16.mxu1 %v5342_v48 }
 0x3a6   :  { %4738 = vmatpush3.bf16.msra.mxu1 %v5343_v26 }
 0x3a7   :  { %4739 = vmatprep.subr.bf16.mxu1 %v5344_v61 }
 0x3a9   :  { %v3011_v60 = vpop.f32.mrf.mxu1 }
 0x3aa   :  { %4740 = vmatpush3.bf16.msra.mxu1 %v5345_v51  ;;  %v6011_v52 = vadd.f32 %v3011_v60, %v5997_v21  ;;  %v5352_v21 = vld [vmem:[#allocation16 + $0xc8] sm:$0xff]  }
 0x3ab   :  { %v3013_v49 = vpop.f32.mrf.mxu1  ;;  %4741 = vmatprep.subr.bf16.mxu1 %v5346_v27 }
 0x3ac   :  { %v6014_v38 = vadd.f32 %v3013_v49, %v5999_v47  ;;  %v3051_v47 = vrot.slane %v6001_v29, %v5791_v40  ;;  %v3479_v29 = vpack.c.bf16 %v5409_v14, %v5409_v14 }
 0x3ad   :  { %v3015_v58 = vpop.f32.mrf.mxu1 }
 0x3ae   :  { %4742 = vmatpush3.bf16.msra.mxu1 %v5347_v56  ;;  %5414 = vtanh.f32 %v6014_v38 }
 0x3af   :  { %v3016_v63 = vpop.f32.mrf.mxu1  ;;  %4743 = vmatprep.subr.bf16.mxu1 %v5348_v57  ;;  %5416 = vtanh.f32 %v6011_v52 }
 0x3b2   :  { %4744 = vmatpush3.bf16.msra.mxu1 %v5349_v59 }
 0x3b3   :  { %4745 = vmatprep.subr.bf16.mxu1 %v5350_v1 }
 0x3b5   :  { %v3165_v17 = vpop.f32.mrf.mxu1 }
 0x3b6   :  { %4746 = vmatpush3.bf16.msra.mxu1 %v5351_v5  ;;  %v3166_v50 = vadd.f32 %v3165_v17, %v3047_v7 }
 0x3b7   :  { %v3167_v8 = vpop.f32.mrf.mxu1  ;;  %4747 = vmatprep.subr.bf16.mxu1 %v5352_v21 }
 0x3b8   :  { %v3168_v10 = vadd.f32 %v3167_v8, %v3051_v47  ;;  %v3237_v15 = vmax.f32 %v3166_v50, 0.0 }
 0x3b9   :  { %v3169_v62 = vpop.f32.mrf.mxu1 }
 0x3ba   :  { %4748 = vmatpush3.bf16.msra.mxu1 %v5353_v32  ;;  %v3170_v11 = vadd.f32 %v3169_v62, %v3047_v7  ;;  %v3238_v42 = vmax.f32 %v3168_v10, 0.0 }
 0x3bb   :  { %v3171_v54 = vpop.f32.mrf.mxu1  ;;  %4749 = vmatprep.subr.bf16.mxu1 %v5354_v18 }
 0x3bc   :  { %v3241_v44 = vmax.f32 %v3170_v11, 0.0  ;;  %v3172_v20 = vadd.f32 %v3171_v54, %v3051_v47 }
 0x3bd   :  { %v3175_v23 = vpop.f32.mrf.mxu1 }
 0x3be   :  { %v3253_v16 = vadd.f32 %v3241_v44, %v3237_v15  ;;  %v3242_v40 = vmax.f32 %v3172_v20, 0.0  ;;  %4750 = vmatpush3.bf16.msra.mxu1 %v5355_v12  ;;  %v3176_v22 = vadd.f32 %v3175_v23, %v3047_v7  ;;  %v5373_v44 = vld [vmem:[#allocation16 + $0x38] sm:$0xff]   ;;  %v5374_v23 = vld [vmem:[#allocation16 + $0x70] sm:$0xff]  }
 0x3bf   :  { %v3177_v24 = vpop.f32.mrf.mxu1 }
 0x3c0   :  { %v3254_v25 = vrot.slane %v3253_v16, 4  ;;  %v3260_v3 = vadd.f32 %v3242_v40, %v3238_v42  ;;  %v3178_v28 = vadd.f32 %v3177_v24, %v3051_v47  ;;  %v3245_v6 = vmax.f32 %v3176_v22, 0.0  ;;  %v5376_v40 = vld [vmem:[#allocation16 + $0x68] sm:$0xff]   ;;  %v5378_v22 = vld [vmem:[#allocation16 + $0x60] sm:$0xff]  }
 0x3c1   :  { %4152 = vmatmul.mubr.bf16.vlgmr.msra.gmra.mxu1 %v3479_v29  ;;  %v3179_v0 = vpop.f32.mrf.mxu1  ;;  %v3478_v42 = vpack.c.bf16 %v5411_v13, %v5411_v13  ;;  %v5377_v29 = vld [vmem:[#allocation16 + $0x28] sm:$0xff]   ;;  %v5379_v24 = vld [vmem:[#allocation16 + $0x20] sm:$0xff]  }
 0x3c2   :  { %v3255_v55 = vadd.f32 %v3254_v25, %v3253_v16  ;;  %v3261_v39 = vrot.slane %v3260_v3, 4  ;;  %v3180_v4 = vadd.f32 %v3179_v0, %v3047_v7  ;;  %v3246_v41 = vmax.f32 %v3178_v28, 0.0  ;;  %v5375_v16 = vld [vmem:[#allocation16 + $0x30] sm:$0xff]   ;;  %v5380_v25 = vld [vmem:[#allocation16 + $0x58] sm:$0xff]  }
 0x3c3   :  { %v3181_v30 = vpop.f32.mrf.mxu1  ;;  %v5382_v28 = vld [vmem:[#allocation16 + $0x50] sm:$0xff]  }
 0x3c4   :  { %v3256_v31 = vrot.slane %v3255_v55, 2  ;;  %v3262_v33 = vadd.f32 %v3261_v39, %v3260_v3  ;;  %v3249_v34 = vmax.f32 %v3180_v4, 0.0  ;;  %v3182_v37 = vadd.f32 %v3181_v30, %v3051_v47  ;;  %v5381_v3 = vld [vmem:[#allocation16 + $0x18] sm:$0xff]   ;;  %v5383_v0 = vld [vmem:[#allocation16 + $0x10] sm:$0xff]   ;;  %v5385_v39 = vld [vmem:[#allocation16 + $0x8] sm:$0xff]  }
 0x3c5   :  { %v5386_v4 = vld [vmem:[#allocation16 + $0x40] sm:$0xff]   ;;  %v5388_v30 = vld [vmem:[#allocation16 + $0x178] sm:$0xff]  }
 0x3c6   :  { %v3257_v35 = vadd.f32 %v3256_v31, %v3255_v55  ;;  %v3263_v36 = vrot.slane %v3262_v33, 2  ;;  %v3281_v43 = vadd.f32 %v3249_v34, %v3245_v6  ;;  %v3250_v19 = vmax.f32 %v3182_v37, 0.0  ;;  %v5384_v55 = vld [vmem:[#allocation16 + $0x48] sm:$0xff]   ;;  %v5387_v6 = vld [vmem:[#allocation16] sm:$0xff]   ;;  %v5413_v31 = vpop.eup %5412  ;;  %v5390_v37 = vld [vmem:[#allocation16 + $0x170] sm:$0xff]  }
 0x3c7   :  { %v3477_v34 = vpack.c.bf16 %v5413_v31, %v5413_v31 }
 0x3c8   :  { %v3264_v53 = vadd.f32 %v3263_v36, %v3262_v33  ;;  %v3282_v45 = vrot.slane %v3281_v43, 4  ;;  %v3288_v46 = vadd.f32 %v3250_v19, %v3246_v41  ;;  %v3258_v48 = vrot.slane %v3257_v35, 1  ;;  %v5415_v33 = vpop.eup %5414  ;;  %v5391_v41 = vld [vmem:[#allocation16 + $0x130] sm:$0xff]   ;;  %v5393_v36 = vld [vmem:[#allocation16 + $0x128] sm:$0xff]   ;;  %v5395_v19 = vld [vmem:[#allocation16 + $0x120] sm:$0xff]  }
 0x3c9   :  { %v3482_v38 = vpack.c.bf16 %v5415_v33, %v5415_v33 }
 0x3ca   :  { %v3265_v2 = vrot.slane %v3264_v53, 1  ;;  %v3283_v26 = vadd.f32 %v3282_v45, %v3281_v43  ;;  %v3289_v61 = vrot.slane %v3288_v46, 4  ;;  %v3259_v60 = vadd.f32 %v3258_v48, %v3257_v35  ;;  %v5392_v35 = vld [vmem:[#allocation16 + $0x168] sm:$0xff]   ;;  %v5394_v43 = vld [vmem:[#allocation16 + $0x160] sm:$0xff]   ;;  %v5397_v45 = vld [vmem:[#allocation16 + $0x118] sm:$0xff]  }
 0x3cb   :  { %v5399_v48 = vld [vmem:[#allocation16 + $0x110] sm:$0xff]  }
 0x3cc   :  { %v3284_v51 = vrot.slane %v3283_v26, 2  ;;  %v3290_v27 = vadd.f32 %v3289_v61, %v3288_v46  ;;  %v3266_v56 = vadd.f32 %v3265_v2, %v3264_v53  ;;  %v3309_v63 = vmul.f32 0.0625, %v3259_v60  ;;  %v5396_v53 = vld [vmem:[#allocation16 + $0x158] sm:$0xff]   ;;  %v5398_v46 = vld [vmem:[#allocation16 + $0x150] sm:$0xff]   ;;  %v5400_v2 = vld [vmem:[#allocation16 + $0x148] sm:$0xff]  }
 0x3cd   :  { %v5402_v61 = vld [vmem:[#allocation16 + $0x140] sm:$0xff]  }
 0x3ce   :  { %v3285_v49 = vadd.f32 %v3284_v51, %v3283_v26  ;;  %v3291_v57 = vrot.slane %v3290_v27, 2  ;;  %v3310_v1 = vmul.f32 0.0625, %v3266_v56  ;;  %v3483_v47 = vpack.c.bf16 %v3309_v63, %v3309_v63  ;;  %v5401_v26 = vld [vmem:[#allocation16 + $0x108] sm:$0xff]   ;;  %v5403_v51 = vld [vmem:[#allocation16 + $0x100] sm:$0xff]  }
 0x3d0   :  { %v3286_v58 = vrot.slane %v3285_v49, 1  ;;  %v3292_v59 = vadd.f32 %v3291_v57, %v3290_v27  ;;  %v3484_v18 = vpack.c.bf16 %v3310_v1, %v3310_v1  ;;  %v3499_v10 = vunpack.c.l.b16 %v3483_v47  ;;  %v5417_v27 = vpop.eup %5416 }
 0x3d1   :  { %v3481_v60 = vpack.c.bf16 %v5417_v27, %v5417_v27 }
 0x3d2   :  { %v3287_v5 = vadd.f32 %v3286_v58, %v3285_v49  ;;  %v3293_v21 = vrot.slane %v3292_v59, 1  ;;  %v3500_v11 = vunpack.c.l.b16 %v3484_v18 }
 0x3d4   :  { %v3313_v7 = vmul.f32 0.0625, %v3287_v5  ;;  %v3294_v17 = vadd.f32 %v3293_v21, %v3292_v59 }
 0x3d6   :  { %v3487_v32 = vpack.c.bf16 %v3313_v7, %v3313_v7  ;;  %v3314_v8 = vmul.f32 0.0625, %v3294_v17 }
 0x3d8   :  { %v3503_v50 = vunpack.c.l.b16 %v3487_v32  ;;  %v3488_v62 = vpack.c.bf16 %v3314_v8, %v3314_v8 }
 0x3da   :  { %v3504_v12 = vunpack.c.l.b16 %v3488_v62  ;;  %v3507_v54 = vsel %vm1185_vm4, %v3503_v50, %v3499_v10 }
 0x3db   :  { %v3511_v20 = vpack.c.b16 %v3507_v54, %v3507_v54 }
 0x3dc   :  { %v3508_v14 = vsel %vm1185_vm4, %v3504_v12, %v3500_v11 }
 0x3dd   :  { %v3512_v15 = vpack.c.b16 %v3508_v14, %v3508_v14 }
 0x3df   :  { %3743 = vmatprep.mubr.bf16.mxu0 %v3512_v15 }
 0x3e0   :  { %3744 = vmatmul.mubr.bf16.vlgmr.msra.gmra.mxu0 %v3511_v20 }
 0x3e1   :  { %4714 = vmatpush3.bf16.msra.mxu0 %v5373_v44  ;;  %4111 = vmatprep.mubr.bf16.mxu0 %v3478_v42 }
 0x3e2   :  { %4715 = vmatprep.subr.bf16.mxu0 %v5374_v23  ;;  %v4668_v23 = vld [vmem:[#allocation17] ss:$0 sm:$0xff] }
 0x3e5   :  { %4716 = vmatpush3.bf16.msra.mxu0 %v5375_v16 }
 0x3e6   :  { %4717 = vmatprep.subr.bf16.mxu0 %v5376_v40 }
 0x3e9   :  { %4718 = vmatpush3.bf16.msra.mxu0 %v5377_v29 }
 0x3ea   :  { %4719 = vmatprep.subr.bf16.mxu0 %v5378_v22 }
 0x3ed   :  { %4720 = vmatpush3.bf16.msra.mxu0 %v5379_v24 }
 0x3ee   :  { %4721 = vmatprep.subr.bf16.mxu0 %v5380_v25 }
 0x3f1   :  { %4722 = vmatpush3.bf16.msra.mxu0 %v5381_v3 }
 0x3f2   :  { %4723 = vmatprep.subr.bf16.mxu0 %v5382_v28 }
 0x3f5   :  { %4724 = vmatpush3.bf16.msra.mxu0 %v5383_v0 }
 0x3f6   :  { %4725 = vmatprep.subr.bf16.mxu0 %v5384_v55 }
 0x3f9   :  { %4726 = vmatpush3.bf16.msra.mxu0 %v5385_v39 }
 0x3fa   :  { %4727 = vmatprep.subr.bf16.mxu0 %v5386_v4 }
 0x3fd   :  { %4728 = vmatpush3.bf16.msra.mxu0 %v5387_v6 }
 0x3fe   :  { %4757 = vmatprep.subr.bf16.mxu0 %v5388_v30 }
 0x400   :  { %4112 = vmatmul.mubr.bf16.vlgmr.msra.gmra.mxu0 %v3477_v34 }
 0x401   :  { %4758 = vmatpush3.bf16.msra.mxu0 %v5389_v9  ;;  %4191 = vmatprep.mubr.bf16.mxu0 %v3482_v38 }
 0x402   :  { %4759 = vmatprep.subr.bf16.mxu0 %v5390_v37 }
 0x405   :  { %4760 = vmatpush3.bf16.msra.mxu0 %v5391_v41 }
 0x406   :  { %4761 = vmatprep.subr.bf16.mxu0 %v5392_v35 }
 0x409   :  { %4762 = vmatpush3.bf16.msra.mxu0 %v5393_v36 }
 0x40a   :  { %4763 = vmatprep.subr.bf16.mxu0 %v5394_v43 }
 0x40d   :  { %4764 = vmatpush3.bf16.msra.mxu0 %v5395_v19 }
 0x40e   :  { %4765 = vmatprep.subr.bf16.mxu0 %v5396_v53 }
 0x411   :  { %4766 = vmatpush3.bf16.msra.mxu0 %v5397_v45 }
 0x412   :  { %4767 = vmatprep.subr.bf16.mxu0 %v5398_v46 }
 0x415   :  { %4768 = vmatpush3.bf16.msra.mxu0 %v5399_v48 }
 0x416   :  { %4769 = vmatprep.subr.bf16.mxu0 %v5400_v2 }
 0x419   :  { %4770 = vmatpush3.bf16.msra.mxu0 %v5401_v26 }
 0x41a   :  { %4771 = vmatprep.subr.bf16.mxu0 %v5402_v61 }
 0x41d   :  { %4772 = vmatpush3.bf16.msra.mxu0 %v5403_v51 }
 0x420   :  { %4192 = vmatmul.mubr.bf16.vlgmr.msra.gmra.mxu0 %v3481_v60 }
 0x461   :  { %v4707_v56 = vpop.f32.mrf.mxu1 }
 0x463   :  { %v4708_v49 = vpop.f32.mrf.mxu1 }
 0x464   :  { %v4709_v52 = vadd.f32 %v4708_v49, %v4707_v56 }
 0x465   :  { %v4710_v57 = vpop.f32.mrf.mxu1 }
 0x467   :  { %v4711_v58 = vpop.f32.mrf.mxu1 }
 0x481   :  { %v4751_v59 = vpop.f32.mrf.mxu1 }
 0x483   :  { %v4752_v63 = vpop.f32.mrf.mxu1 }
 0x484   :  { %v4753_v1 = vadd.f32 %v4752_v63, %v4751_v59 }
 0x485   :  { %v4754_v5 = vpop.f32.mrf.mxu1 }
 0x487   :  { %v4755_v21 = vpop.f32.mrf.mxu1 }
 0x4a0   :  { %v4685_v7 = vpop.f32.mrf.mxu0 }
 0x4a2   :  { %v4686_v17 = vpop.f32.mrf.mxu0 }
 0x4a3   :  { %v4687_v8 = vadd.f32 %v4686_v17, %v4685_v7 }
 0x4a4   :  { %v4688_v47 = vpop.f32.mrf.mxu0 }
 0x4a5   :  { %v3786_v62 = vadd.f32 %v4709_v52, %v4687_v8 }
 0x4a6   :  { %v4689_v32 = vpop.f32.mrf.mxu0 }
 0x4c0   :  { %v4729_v18 = vpop.f32.mrf.mxu0 }
 0x4c2   :  { %v4730_v50 = vpop.f32.mrf.mxu0 }
 0x4c3   :  { %v4731_v10 = vadd.f32 %v4730_v50, %v4729_v18 }
 0x4c4   :  { %v4732_v11 = vpop.f32.mrf.mxu0 }
 0x4c5   :  { %v4114_v12 = vadd.f32 %v4731_v10, %v3786_v62 }
 0x4c6   :  { %v4733_v54 = vpop.f32.mrf.mxu0 }
 0x4c7   :  { %v4154_v13 = vadd.f32 %v4753_v1, %v4114_v12 }
 0x4e0   :  { %v4773_v14 = vpop.f32.mrf.mxu0 }
 0x4e2   :  { %v4774_v15 = vpop.f32.mrf.mxu0 }
 0x4e3   :  { %v4775_v44 = vadd.f32 %v4774_v15, %v4773_v14 }
 0x4e4   :  { %v4776_v20 = vpop.f32.mrf.mxu0 }
 0x4e5   :  { %v4194_v42 = vadd.f32 %v4775_v44, %v4154_v13 }
 0x4e6   :  { %v4777_v16 = vpop.f32.mrf.mxu0 }
 0x4e7   :  { %v4206_v40 = vadd.f32 %v4668_v23, %v4194_v42 }
 0x4e9   :  { %4207 = vst [vmem:[#allocation19] sm:$0x3] %v4206_v40 }
 0x4ea   :  { %5630 = shalt.err (!%p5627_p12)
}
 0x4eb   :  { %4217 = dma.vmem_to_hbm [thread:$0]  %s4215_s20, 32, %s6042_s12, [#allocation4]  }
 0x4ec   :  { %5651 = dma.done.wait [#allocation4], 32  }
 0x4ed   :  { %5652 = vsyncadd [#allocation4], 4294967264 }
 0x4ee   :  { %4221 = vsyncpa [#allocation3], 1 }
 0x4ef   :  { %4222 = vsyncpa [#allocation6], 1 }
 0x4f0   :  { %4223 = vsyncpa [#allocation9], 1 }
 0x4f1   :  { %4224 = vsyncpa [#allocation12], 1 }
 0x4f2   :  { %4225 = vsyncpa [#allocation15], 1 }
 0x4f3   :  { %4226 = vsyncpa [#allocation18], 1 }
 0x4f4   :  { %4227 = vsyncpa [#allocation4], 1 }

</bundles_post_ra>
